<compile_context>
chip_gen: v7x
topology: tpu7x:2x2x1
jax: 0.10.0
libtpu: 0.0.40
codegen_flags: <defaults>
</compile_context>

<pallas_src>
import functools

import jax
import jax.numpy as jnp
from jax import lax
from jax.experimental import pallas as pl
from jax.experimental.pallas import tpu as pltpu

EPS = 1e-5
_NUM_SHARDS = 2     # leading "parallel" grid axis for pass 1 (v7x has 2 TCs/chip)
_LANE = 128
_TM_GRAN = 64       # token-tile granularity (multiple of f32/bf16 sublane tiles)


def _round_up(x, m):
    return ((x + m - 1) // m) * m


def _cdiv(a, b):
    return -(-a // b)


def _vmem_capacity_bytes():
    try:
        return int(pltpu.get_tpu_info().vmem_capacity_bytes)
    except Exception:
        return 64 << 20        # conservative default (v7x per-core VMEM)


def _pick_token_tile(tokens_per_shard, c_in, c_out_p, act_bytes, vmem_budget):
    """Largest 64-aligned token tile whose double-buffered tiles fit the budget."""
    # double-buffered xa+xb input tiles + double-buffered f32 output tile
    per_token = 2 * (2 * c_in * act_bytes) + 2 * (c_out_p * 4)
    tm = vmem_budget // max(per_token, 1)
    tm = min(tm, 2048, _round_up(max(tokens_per_shard, 1), _TM_GRAN))
    tm = max(_TM_GRAN, (tm // _TM_GRAN) * _TM_GRAN)
    return tm


def _conv_dot(x, w):
    """(tm, C_in) @ (C_in, C_half_p) with f32 accumulation.

    Real channel counts feed the MXU; for a very small contraction depth a
    handful of broadcast FMAs (exact f32) avoids a depth-<8 MXU pass.
    """
    k = x.shape[1]
    if k >= 8:
        return jnp.dot(x, w, preferred_element_type=jnp.float32)
    x32 = x.astype(jnp.float32)
    w32 = w.astype(jnp.float32)
    y = x32[:, 0:1] * w32[0:1, :]
    for i in range(1, k):
        y = y + x32[:, i:i + 1] * w32[i:i + 1, :]
    return y


# ---------------------------------------------------------------------------
# Pass 1: per-channel (sum, sum of squares) of the two 1x1-conv outputs.
# stats_ref is a (1, 2, C_out_p) grid-resident accumulator for this shard.
# ---------------------------------------------------------------------------
def _stats_kernel(xa_ref, xb_ref, w1_ref, w2_ref, stats_ref):
    @pl.when(pl.program_id(1) == 0)
    def _():
        stats_ref[...] = jnp.zeros_like(stats_ref)

    y1 = _conv_dot(xa_ref[...], w1_ref[...])          # (tm, C_half_p) f32
    y2 = _conv_dot(xb_ref[...], w2_ref[...])
    s = jnp.concatenate([jnp.sum(y1, axis=0, keepdims=True),
                         jnp.sum(y2, axis=0, keepdims=True)], axis=1)
    sq = jnp.concatenate([jnp.sum(y1 * y1, axis=0, keepdims=True),
                          jnp.sum(y2 * y2, axis=0, keepdims=True)], axis=1)
    stats_ref[...] += jnp.concatenate([s, sq], axis=0)[None]


# ---------------------------------------------------------------------------
# Pass 2: recompute the cheap 1x1 conv and apply y * scale + shift per channel.
# ---------------------------------------------------------------------------
def _apply_kernel(xa_ref, xb_ref, w1_ref, w2_ref, ss_ref, o_ref, *, c_half_p):
    y1 = _conv_dot(xa_ref[...], w1_ref[...])
    y2 = _conv_dot(xb_ref[...], w2_ref[...])
    # Lane-dense stores at 128-aligned column offsets.
    o_ref[:, :c_half_p] = y1 * ss_ref[0:1, :c_half_p] + ss_ref[1:2, :c_half_p]
    o_ref[:, c_half_p:] = y2 * ss_ref[0:1, c_half_p:] + ss_ref[1:2, c_half_p:]


def factorized_reduce_forward(x_nchw, conv1_w, conv2_w, *,
                              compute_dtype=jnp.bfloat16, out_layout="NCHW"):
    N, C_in, H, W = x_nchw.shape
    assert H % 2 == 0 and W % 2 == 0, "FactorizedReduce requires even H, W"
    C_half = conv1_w.shape[0]
    assert conv2_w.shape[0] == C_half and conv1_w.shape[1] == C_in
    C_out = 2 * C_half
    Ho, Wo = H // 2, W // 2
    T = N * Ho * Wo

    # Lane-dense channel padding (stores/stats last dim multiple of 128).
    C_half_p = _round_up(C_half, _LANE)
    C_out_p = 2 * C_half_p

    act_bytes = jnp.dtype(compute_dtype).itemsize
    vmem_cap = _vmem_capacity_bytes()
    vmem_limit = max(32 << 20, min(vmem_cap // 2, 64 << 20))
    tm = _pick_token_tile(_cdiv(T, _NUM_SHARDS), C_in, C_out_p, act_bytes,
                          vmem_budget=vmem_limit // 2)
    nt_per_shard = max(1, _cdiv(T, tm * _NUM_SHARDS))
    nt = nt_per_shard * _NUM_SHARDS
    T_pad = nt * tm

    # Token-major (channels-last) views of the two strided pixel lattices.
    # conv2 reads x[:, :, 1:, 1:] with stride 2 == the (1, 1) lattice.
    x = x_nchw.astype(compute_dtype)
    xa = jnp.transpose(x[:, :, 0::2, 0::2], (0, 2, 3, 1)).reshape(T, C_in)
    xb = jnp.transpose(x[:, :, 1::2, 1::2], (0, 2, 3, 1)).reshape(T, C_in)
    if T_pad != T:   # zero rows contribute nothing to the BN sums; sliced off later
        pad = ((0, T_pad - T), (0, 0))
        xa = jnp.pad(xa, pad)
        xb = jnp.pad(xb, pad)

    # (C_in, C_half_p) weights; zero-padded output channels stay exactly zero.
    def _prep_w(w):
        w = w.reshape(C_half, C_in).T.astype(jnp.float32)
        return jnp.pad(w, ((0, 0), (0, C_half_p - C_half))).astype(compute_dtype)
    w1 = _prep_w(conv1_w)
    w2 = _prep_w(conv2_w)

    # ---------------- Pass 1: cross-tile BN statistics ----------------
    x_spec1 = pl.BlockSpec((tm, C_in), lambda s, t: (s * nt_per_shard + t, 0))
    w_spec1 = pl.BlockSpec((C_in, C_half_p), lambda s, t: (0, 0))

    stats = pl.pallas_call(
        _stats_kernel,
        grid=(_NUM_SHARDS, nt_per_shard),
        in_specs=[x_spec1, x_spec1, w_spec1, w_spec1],
        out_specs=pl.BlockSpec((1, 2, C_out_p), lambda s, t: (s, 0, 0)),
        out_shape=jax.ShapeDtypeStruct((_NUM_SHARDS, 2, C_out_p), jnp.float32),
        compiler_params=pltpu.CompilerParams(
            dimension_semantics=("parallel", "arbitrary"),
            vmem_limit_bytes=vmem_limit),
        cost_estimate=pl.CostEstimate(
            flops=2 * T_pad * C_in * C_out_p + 4 * T_pad * C_out_p,
            transcendentals=0,
            bytes_accessed=act_bytes * (2 * T_pad * C_in + 4 * C_in * C_half_p)
                           + 4 * _NUM_SHARDS * 2 * C_out_p),
    )(xa, xb, w1, w2)

    # Tiny finalize: batch mean / biased variance -> per-channel scale & shift.
    tot = jnp.sum(stats, axis=0)                       # (2, C_out_p)
    mean = tot[0] / T
    var = jnp.maximum(tot[1] / T - mean * mean, 0.0)   # clamp f32 cancellation
    inv = lax.rsqrt(var + EPS)
    scale_shift = jnp.stack([inv, -mean * inv])        # (2, C_out_p) f32

    # ---------------- Pass 2: recompute conv + apply BN (fully parallel) ----
    x_spec2 = pl.BlockSpec((tm, C_in), lambda t: (t, 0))
    w_spec2 = pl.BlockSpec((C_in, C_half_p), lambda t: (0, 0))

    out_tok = pl.pallas_call(
        functools.partial(_apply_kernel, c_half_p=C_half_p),
        grid=(nt,),
        in_specs=[x_spec2, x_spec2, w_spec2, w_spec2,
                  pl.BlockSpec((2, C_out_p), lambda t: (0, 0))],
        out_specs=pl.BlockSpec((tm, C_out_p), lambda t: (t, 0)),
        out_shape=jax.ShapeDtypeStruct((T_pad, C_out_p), jnp.float32),
        compiler_params=pltpu.CompilerParams(
            dimension_semantics=("parallel",),
            vmem_limit_bytes=vmem_limit),
        cost_estimate=pl.CostEstimate(
            flops=2 * T_pad * C_in * C_out_p + 2 * T_pad * C_out_p,
            transcendentals=0,
            bytes_accessed=act_bytes * (2 * T_pad * C_in + 4 * C_in * C_half_p)
                           + 4 * (T_pad * C_out_p + 2 * C_out_p)),
    )(xa, xb, w1, w2, scale_shift)

    # Drop token / channel padding and restore the requested layout.
    out_tok = out_tok[:T]
    if C_half_p == C_half:
        out_tok = out_tok[:, :C_out]
    else:
        out_tok = jnp.concatenate(
            [out_tok[:, :C_half], out_tok[:, C_half_p:C_half_p + C_half]], axis=1)
    out_nhwc = out_tok.reshape(N, Ho, Wo, C_out)
    if out_layout == "NHWC":   # consumers that accept NHWC skip one relayout pass
        return out_nhwc
    return jnp.transpose(out_nhwc, (0, 3, 1, 2))


def ref_forward(x, conv1_w, conv2_w):
    """Pure-JAX reference of the PyTorch forward (training-mode BN)."""
    C_half, C_in = conv1_w.shape[0], conv1_w.shape[1]
    x = x.astype(jnp.float32)
    hp = lax.Precision.HIGHEST
    y1 = jnp.einsum("oi,nihw->nohw", conv1_w.reshape(C_half, C_in),
                    x[:, :, 0::2, 0::2], precision=hp)
    y2 = jnp.einsum("oi,nihw->nohw", conv2_w.reshape(C_half, C_in),
                    x[:, :, 1::2, 1::2], precision=hp)
    y = jnp.concatenate([y1, y2], axis=1)
    m = jnp.mean(y, axis=(0, 2, 3), keepdims=True)
    v = jnp.mean(jnp.square(y - m), axis=(0, 2, 3), keepdims=True)
    return (y - m) * lax.rsqrt(v + EPS)


if __name__ == "__main__":
    key = jax.random.PRNGKey(0)
    kx, k1, k2 = jax.random.split(key, 3)
    N, C_in, C_out, H, W = 2, 4, 8, 16, 16

    x = jax.random.normal(kx, (N, C_in, H, W), jnp.float32)
    # Conv2d weights, shape (C_out//2, C_in, 1, 1), bias=False.
    w1 = jax.random.normal(k1, (C_out // 2, C_in, 1, 1), jnp.float32) * 0.1
    w2 = jax.random.normal(k2, (C_out // 2, C_in, 1, 1), jnp.float32) * 0.1

    ref = ref_forward(x, w1, w2)

    # Exact-precision path (f32 activations): tight check of the kernel math.
    fwd_f32 = jax.jit(functools.partial(factorized_reduce_forward,
                                        compute_dtype=jnp.float32))
    out_f32 = jax.block_until_ready(fwd_f32(x, w1, w2))
    assert out_f32.shape == ref.shape == (N, C_out, H // 2, W // 2)
    assert jnp.allclose(out_f32, ref, atol=1e-4, rtol=1e-4), "f32 mismatch vs reference"

    # Default optimized path: bf16 activations/weights, f32 stats & BN math.
    # bf16 input rounding (~0.4% relative) dominates the tolerance here.
    fwd = jax.jit(factorized_reduce_forward)
    out = jax.block_until_ready(fwd(x, w1, w2))
    assert out.shape == ref.shape
    assert jnp.allclose(out, ref, atol=5e-2, rtol=5e-2), "bf16 mismatch vs reference"

    print("KERNEL_OK")
</pallas_src>

<mosaic_0001>
module attributes {stable_mosaic.version = 11 : i64} {
  func.func @_apply_kernel(%arg0: i32, %arg1: memref<64x4xf32, #tpu.memory_space<vmem>>, %arg2: memref<64x4xf32, #tpu.memory_space<vmem>>, %arg3: memref<4x128xf32, #tpu.memory_space<vmem>>, %arg4: memref<4x128xf32, #tpu.memory_space<vmem>>, %arg5: memref<2x256xf32, #tpu.memory_space<vmem>>, %arg6: memref<64x256xf32, #tpu.memory_space<vmem>>) attributes {dimension_semantics = [#tpu.dimension_semantics<parallel>], iteration_bounds = array<i64: 2>, scalar_prefetch = 0 : i64, scratch_operands = 0 : i64, tpu.core_type = #tpu.core_type<tc>, window_params = [{transform_indices = @transform_0, window_bounds = array<i64: 64, 4>}, {transform_indices = @transform_1, window_bounds = array<i64: 64, 4>}, {pipeline_mode = #tpu.pipeline_mode<synchronous>, transform_indices = @transform_2, window_bounds = array<i64: 4, 128>}, {pipeline_mode = #tpu.pipeline_mode<synchronous>, transform_indices = @transform_3, window_bounds = array<i64: 4, 128>}, {pipeline_mode = #tpu.pipeline_mode<synchronous>, transform_indices = @transform_4, window_bounds = array<i64: 2, 256>}, {transform_indices = @transform_5, window_bounds = array<i64: 64, 256>}]} {
    %c0 = arith.constant 0 : index
    %c0_0 = arith.constant 0 : index
    %0 = vector.load %arg1[%c0, %c0_0] : memref<64x4xf32, #tpu.memory_space<vmem>>, vector<64x4xf32>
    %c0_1 = arith.constant 0 : index
    %c0_2 = arith.constant 0 : index
    %1 = vector.load %arg3[%c0_1, %c0_2] : memref<4x128xf32, #tpu.memory_space<vmem>>, vector<4x128xf32>
    %2 = vector.extract_strided_slice %0 {offsets = [0, 0], sizes = [64, 1], strides = [1, 1]} : vector<64x4xf32> to vector<64x1xf32>
    %3 = vector.extract_strided_slice %1 {offsets = [0, 0], sizes = [1, 128], strides = [1, 1]} : vector<4x128xf32> to vector<1x128xf32>
    %4 = vector.broadcast %2 : vector<64x1xf32> to vector<64x128xf32>
    %5 = vector.broadcast %3 : vector<1x128xf32> to vector<64x128xf32>
    %6 = arith.mulf %4, %5 : vector<64x128xf32>
    %7 = vector.extract_strided_slice %0 {offsets = [0, 1], sizes = [64, 1], strides = [1, 1]} : vector<64x4xf32> to vector<64x1xf32>
    %8 = vector.extract_strided_slice %1 {offsets = [1, 0], sizes = [1, 128], strides = [1, 1]} : vector<4x128xf32> to vector<1x128xf32>
    %9 = vector.broadcast %7 : vector<64x1xf32> to vector<64x128xf32>
    %10 = vector.broadcast %8 : vector<1x128xf32> to vector<64x128xf32>
    %11 = arith.mulf %9, %10 : vector<64x128xf32>
    %12 = arith.addf %6, %11 : vector<64x128xf32>
    %13 = vector.extract_strided_slice %0 {offsets = [0, 2], sizes = [64, 1], strides = [1, 1]} : vector<64x4xf32> to vector<64x1xf32>
    %14 = vector.extract_strided_slice %1 {offsets = [2, 0], sizes = [1, 128], strides = [1, 1]} : vector<4x128xf32> to vector<1x128xf32>
    %15 = vector.broadcast %13 : vector<64x1xf32> to vector<64x128xf32>
    %16 = vector.broadcast %14 : vector<1x128xf32> to vector<64x128xf32>
    %17 = arith.mulf %15, %16 : vector<64x128xf32>
    %18 = arith.addf %12, %17 : vector<64x128xf32>
    %19 = vector.extract_strided_slice %0 {offsets = [0, 3], sizes = [64, 1], strides = [1, 1]} : vector<64x4xf32> to vector<64x1xf32>
    %20 = vector.extract_strided_slice %1 {offsets = [3, 0], sizes = [1, 128], strides = [1, 1]} : vector<4x128xf32> to vector<1x128xf32>
    %21 = vector.broadcast %19 : vector<64x1xf32> to vector<64x128xf32>
    %22 = vector.broadcast %20 : vector<1x128xf32> to vector<64x128xf32>
    %23 = arith.mulf %21, %22 : vector<64x128xf32>
    %24 = arith.addf %18, %23 : vector<64x128xf32>
    %c0_3 = arith.constant 0 : index
    %c0_4 = arith.constant 0 : index
    %25 = vector.load %arg2[%c0_3, %c0_4] : memref<64x4xf32, #tpu.memory_space<vmem>>, vector<64x4xf32>
    %c0_5 = arith.constant 0 : index
    %c0_6 = arith.constant 0 : index
    %26 = vector.load %arg4[%c0_5, %c0_6] : memref<4x128xf32, #tpu.memory_space<vmem>>, vector<4x128xf32>
    %27 = vector.extract_strided_slice %25 {offsets = [0, 0], sizes = [64, 1], strides = [1, 1]} : vector<64x4xf32> to vector<64x1xf32>
    %28 = vector.extract_strided_slice %26 {offsets = [0, 0], sizes = [1, 128], strides = [1, 1]} : vector<4x128xf32> to vector<1x128xf32>
    %29 = vector.broadcast %27 : vector<64x1xf32> to vector<64x128xf32>
    %30 = vector.broadcast %28 : vector<1x128xf32> to vector<64x128xf32>
    %31 = arith.mulf %29, %30 : vector<64x128xf32>
    %32 = vector.extract_strided_slice %25 {offsets = [0, 1], sizes = [64, 1], strides = [1, 1]} : vector<64x4xf32> to vector<64x1xf32>
    %33 = vector.extract_strided_slice %26 {offsets = [1, 0], sizes = [1, 128], strides = [1, 1]} : vector<4x128xf32> to vector<1x128xf32>
    %34 = vector.broadcast %32 : vector<64x1xf32> to vector<64x128xf32>
    %35 = vector.broadcast %33 : vector<1x128xf32> to vector<64x128xf32>
    %36 = arith.mulf %34, %35 : vector<64x128xf32>
    %37 = arith.addf %31, %36 : vector<64x128xf32>
    %38 = vector.extract_strided_slice %25 {offsets = [0, 2], sizes = [64, 1], strides = [1, 1]} : vector<64x4xf32> to vector<64x1xf32>
    %39 = vector.extract_strided_slice %26 {offsets = [2, 0], sizes = [1, 128], strides = [1, 1]} : vector<4x128xf32> to vector<1x128xf32>
    %40 = vector.broadcast %38 : vector<64x1xf32> to vector<64x128xf32>
    %41 = vector.broadcast %39 : vector<1x128xf32> to vector<64x128xf32>
    %42 = arith.mulf %40, %41 : vector<64x128xf32>
    %43 = arith.addf %37, %42 : vector<64x128xf32>
    %44 = vector.extract_strided_slice %25 {offsets = [0, 3], sizes = [64, 1], strides = [1, 1]} : vector<64x4xf32> to vector<64x1xf32>
    %45 = vector.extract_strided_slice %26 {offsets = [3, 0], sizes = [1, 128], strides = [1, 1]} : vector<4x128xf32> to vector<1x128xf32>
    %46 = vector.broadcast %44 : vector<64x1xf32> to vector<64x128xf32>
    %47 = vector.broadcast %45 : vector<1x128xf32> to vector<64x128xf32>
    %48 = arith.mulf %46, %47 : vector<64x128xf32>
    %49 = arith.addf %43, %48 : vector<64x128xf32>
    %c0_7 = arith.constant 0 : index
    %c0_8 = arith.constant 0 : index
    %50 = vector.load %arg5[%c0_7, %c0_8] : memref<2x256xf32, #tpu.memory_space<vmem>>, vector<1x128xf32>
    %51 = vector.broadcast %50 : vector<1x128xf32> to vector<64x128xf32>
    %52 = arith.mulf %24, %51 : vector<64x128xf32>
    %c1 = arith.constant 1 : index
    %c0_9 = arith.constant 0 : index
    %53 = vector.load %arg5[%c1, %c0_9] : memref<2x256xf32, #tpu.memory_space<vmem>>, vector<1x128xf32>
    %54 = vector.broadcast %53 : vector<1x128xf32> to vector<64x128xf32>
    %55 = arith.addf %52, %54 : vector<64x128xf32>
    %c0_10 = arith.constant 0 : index
    %c0_11 = arith.constant 0 : index
    %56 = vector.load %arg6[%c0_10, %c0_11] : memref<64x256xf32, #tpu.memory_space<vmem>>, vector<64x128xf32>
    tpu.vector_store %arg6[%c0_10, %c0_11], %55 {strides = array<i32>} : memref<64x256xf32, #tpu.memory_space<vmem>>, vector<64x128xf32>,
    %c0_12 = arith.constant 0 : index
    %c128 = arith.constant 128 : index
    %57 = vector.load %arg5[%c0_12, %c128] : memref<2x256xf32, #tpu.memory_space<vmem>>, vector<1x128xf32>
    %58 = vector.broadcast %57 : vector<1x128xf32> to vector<64x128xf32>
    %59 = arith.mulf %49, %58 : vector<64x128xf32>
    %c1_13 = arith.constant 1 : index
    %c128_14 = arith.constant 128 : index
    %60 = vector.load %arg5[%c1_13, %c128_14] : memref<2x256xf32, #tpu.memory_space<vmem>>, vector<1x128xf32>
    %61 = vector.broadcast %60 : vector<1x128xf32> to vector<64x128xf32>
    %62 = arith.addf %59, %61 : vector<64x128xf32>
    %c0_15 = arith.constant 0 : index
    %c128_16 = arith.constant 128 : index
    %63 = vector.load %arg6[%c0_15, %c128_16] : memref<64x256xf32, #tpu.memory_space<vmem>>, vector<64x128xf32>
    tpu.vector_store %arg6[%c0_15, %c128_16], %62 {strides = array<i32>} : memref<64x256xf32, #tpu.memory_space<vmem>>, vector<64x128xf32>,
    return
  }
  func.func @transform_0(%arg0: i32) -> (i32, i32) {
    %c0_i32 = arith.constant 0 : i32
    %c0_i32_0 = arith.constant 0 : i32
    return %arg0, %c0_i32 : i32, i32
  }
  func.func @transform_1(%arg0: i32) -> (i32, i32) {
    %c0_i32 = arith.constant 0 : i32
    %c0_i32_0 = arith.constant 0 : i32
    return %arg0, %c0_i32 : i32, i32
  }
  func.func @transform_2(%arg0: i32) -> (i32, i32) {
    %c0_i32 = arith.constant 0 : i32
    %c0_i32_0 = arith.constant 0 : i32
    %c0_i32_1 = arith.constant 0 : i32
    return %c0_i32, %c0_i32_0 : i32, i32
  }
  func.func @transform_3(%arg0: i32) -> (i32, i32) {
    %c0_i32 = arith.constant 0 : i32
    %c0_i32_0 = arith.constant 0 : i32
    %c0_i32_1 = arith.constant 0 : i32
    return %c0_i32, %c0_i32_0 : i32, i32
  }
  func.func @transform_4(%arg0: i32) -> (i32, i32) {
    %c0_i32 = arith.constant 0 : i32
    %c0_i32_0 = arith.constant 0 : i32
    %c0_i32_1 = arith.constant 0 : i32
    return %c0_i32, %c0_i32_0 : i32, i32
  }
  func.func @transform_5(%arg0: i32) -> (i32, i32) {
    %c0_i32 = arith.constant 0 : i32
    %c0_i32_0 = arith.constant 0 : i32
    return %arg0, %c0_i32 : i32, i32
  }
}

module attributes {stable_mosaic.version = 11 : i64} {
  func.func @_stats_kernel(%arg0: i32, %arg1: i32, %arg2: memref<64x4xf32, #tpu.memory_space<vmem>>, %arg3: memref<64x4xf32, #tpu.memory_space<vmem>>, %arg4: memref<4x128xf32, #tpu.memory_space<vmem>>, %arg5: memref<4x128xf32, #tpu.memory_space<vmem>>, %arg6: memref<1x2x256xf32, #tpu.memory_space<vmem>>) attributes {dimension_semantics = [#tpu.dimension_semantics<parallel>, #tpu.dimension_semantics<arbitrary>], iteration_bounds = array<i64: 2, 1>, scalar_prefetch = 0 : i64, scratch_operands = 0 : i64, tpu.core_type = #tpu.core_type<tc>, window_params = [{transform_indices = @transform_0, window_bounds = array<i64: 64, 4>}, {transform_indices = @transform_1, window_bounds = array<i64: 64, 4>}, {pipeline_mode = #tpu.pipeline_mode<synchronous>, transform_indices = @transform_2, window_bounds = array<i64: 4, 128>}, {pipeline_mode = #tpu.pipeline_mode<synchronous>, transform_indices = @transform_3, window_bounds = array<i64: 4, 128>}, {transform_indices = @transform_4, window_bounds = array<i64: 1, 2, 256>}]} {
    %c0_i32 = arith.constant 0 : i32
    %0 = arith.cmpi eq, %arg1, %c0_i32 : i32
    %1 = arith.extui %0 : i1 to i32
    %c0_i32_0 = arith.constant 0 : i32
    %2 = arith.cmpi ne, %1, %c0_i32_0 : i32
    scf.if %2 {
      %cst_17 = arith.constant 0.000000e+00 : f32
      %70 = vector.broadcast %cst_17 : f32 to vector<1x2x256xf32>
      %c0_18 = arith.constant 0 : index
      %c0_19 = arith.constant 0 : index
      %c0_20 = arith.constant 0 : index
      %71 = vector.load %arg6[%c0_18, %c0_19, %c0_20] : memref<1x2x256xf32, #tpu.memory_space<vmem>>, vector<1x2x256xf32>
      tpu.vector_store %arg6[%c0_18, %c0_19, %c0_20], %70 {strides = array<i32>} : memref<1x2x256xf32, #tpu.memory_space<vmem>>, vector<1x2x256xf32>,
    } else {
    }
    %c0 = arith.constant 0 : index
    %c0_1 = arith.constant 0 : index
    %3 = vector.load %arg2[%c0, %c0_1] : memref<64x4xf32, #tpu.memory_space<vmem>>, vector<64x4xf32>
    %c0_2 = arith.constant 0 : index
    %c0_3 = arith.constant 0 : index
    %4 = vector.load %arg4[%c0_2, %c0_3] : memref<4x128xf32, #tpu.memory_space<vmem>>, vector<4x128xf32>
    %5 = vector.extract_strided_slice %3 {offsets = [0, 0], sizes = [64, 1], strides = [1, 1]} : vector<64x4xf32> to vector<64x1xf32>
    %6 = vector.extract_strided_slice %4 {offsets = [0, 0], sizes = [1, 128], strides = [1, 1]} : vector<4x128xf32> to vector<1x128xf32>
    %7 = vector.broadcast %5 : vector<64x1xf32> to vector<64x128xf32>
    %8 = vector.broadcast %6 : vector<1x128xf32> to vector<64x128xf32>
    %9 = arith.mulf %7, %8 : vector<64x128xf32>
    %10 = vector.extract_strided_slice %3 {offsets = [0, 1], sizes = [64, 1], strides = [1, 1]} : vector<64x4xf32> to vector<64x1xf32>
    %11 = vector.extract_strided_slice %4 {offsets = [1, 0], sizes = [1, 128], strides = [1, 1]} : vector<4x128xf32> to vector<1x128xf32>
    %12 = vector.broadcast %10 : vector<64x1xf32> to vector<64x128xf32>
    %13 = vector.broadcast %11 : vector<1x128xf32> to vector<64x128xf32>
    %14 = arith.mulf %12, %13 : vector<64x128xf32>
    %15 = arith.addf %9, %14 : vector<64x128xf32>
    %16 = vector.extract_strided_slice %3 {offsets = [0, 2], sizes = [64, 1], strides = [1, 1]} : vector<64x4xf32> to vector<64x1xf32>
    %17 = vector.extract_strided_slice %4 {offsets = [2, 0], sizes = [1, 128], strides = [1, 1]} : vector<4x128xf32> to vector<1x128xf32>
    %18 = vector.broadcast %16 : vector<64x1xf32> to vector<64x128xf32>
    %19 = vector.broadcast %17 : vector<1x128xf32> to vector<64x128xf32>
    %20 = arith.mulf %18, %19 : vector<64x128xf32>
    %21 = arith.addf %15, %20 : vector<64x128xf32>
    %22 = vector.extract_strided_slice %3 {offsets = [0, 3], sizes = [64, 1], strides = [1, 1]} : vector<64x4xf32> to vector<64x1xf32>
    %23 = vector.extract_strided_slice %4 {offsets = [3, 0], sizes = [1, 128], strides = [1, 1]} : vector<4x128xf32> to vector<1x128xf32>
    %24 = vector.broadcast %22 : vector<64x1xf32> to vector<64x128xf32>
    %25 = vector.broadcast %23 : vector<1x128xf32> to vector<64x128xf32>
    %26 = arith.mulf %24, %25 : vector<64x128xf32>
    %27 = arith.addf %21, %26 : vector<64x128xf32>
    %c0_4 = arith.constant 0 : index
    %c0_5 = arith.constant 0 : index
    %28 = vector.load %arg3[%c0_4, %c0_5] : memref<64x4xf32, #tpu.memory_space<vmem>>, vector<64x4xf32>
    %c0_6 = arith.constant 0 : index
    %c0_7 = arith.constant 0 : index
    %29 = vector.load %arg5[%c0_6, %c0_7] : memref<4x128xf32, #tpu.memory_space<vmem>>, vector<4x128xf32>
    %30 = vector.extract_strided_slice %28 {offsets = [0, 0], sizes = [64, 1], strides = [1, 1]} : vector<64x4xf32> to vector<64x1xf32>
    %31 = vector.extract_strided_slice %29 {offsets = [0, 0], sizes = [1, 128], strides = [1, 1]} : vector<4x128xf32> to vector<1x128xf32>
    %32 = vector.broadcast %30 : vector<64x1xf32> to vector<64x128xf32>
    %33 = vector.broadcast %31 : vector<1x128xf32> to vector<64x128xf32>
    %34 = arith.mulf %32, %33 : vector<64x128xf32>
    %35 = vector.extract_strided_slice %28 {offsets = [0, 1], sizes = [64, 1], strides = [1, 1]} : vector<64x4xf32> to vector<64x1xf32>
    %36 = vector.extract_strided_slice %29 {offsets = [1, 0], sizes = [1, 128], strides = [1, 1]} : vector<4x128xf32> to vector<1x128xf32>
    %37 = vector.broadcast %35 : vector<64x1xf32> to vector<64x128xf32>
    %38 = vector.broadcast %36 : vector<1x128xf32> to vector<64x128xf32>
    %39 = arith.mulf %37, %38 : vector<64x128xf32>
    %40 = arith.addf %34, %39 : vector<64x128xf32>
    %41 = vector.extract_strided_slice %28 {offsets = [0, 2], sizes = [64, 1], strides = [1, 1]} : vector<64x4xf32> to vector<64x1xf32>
    %42 = vector.extract_strided_slice %29 {offsets = [2, 0], sizes = [1, 128], strides = [1, 1]} : vector<4x128xf32> to vector<1x128xf32>
    %43 = vector.broadcast %41 : vector<64x1xf32> to vector<64x128xf32>
    %44 = vector.broadcast %42 : vector<1x128xf32> to vector<64x128xf32>
    %45 = arith.mulf %43, %44 : vector<64x128xf32>
    %46 = arith.addf %40, %45 : vector<64x128xf32>
    %47 = vector.extract_strided_slice %28 {offsets = [0, 3], sizes = [64, 1], strides = [1, 1]} : vector<64x4xf32> to vector<64x1xf32>
    %48 = vector.extract_strided_slice %29 {offsets = [3, 0], sizes = [1, 128], strides = [1, 1]} : vector<4x128xf32> to vector<1x128xf32>
    %49 = vector.broadcast %47 : vector<64x1xf32> to vector<64x128xf32>
    %50 = vector.broadcast %48 : vector<1x128xf32> to vector<64x128xf32>
    %51 = arith.mulf %49, %50 : vector<64x128xf32>
    %52 = arith.addf %46, %51 : vector<64x128xf32>
    %cst = arith.constant dense<0.000000e+00> : vector<128xf32>
    %53 = vector.multi_reduction <add>, %27, %cst [0] : vector<64x128xf32> to vector<128xf32>
    %54 = vector.shape_cast %53 : vector<128xf32> to vector<1x128xf32>
    %cst_8 = arith.constant dense<0.000000e+00> : vector<128xf32>
    %55 = vector.multi_reduction <add>, %52, %cst_8 [0] : vector<64x128xf32> to vector<128xf32>
    %56 = vector.shape_cast %55 : vector<128xf32> to vector<1x128xf32>
    %57 = tpu.concatenate %54, %56 in 1 : vector<1x128xf32>, vector<1x128xf32> -> vector<1x256xf32>
    %58 = arith.mulf %27, %27 : vector<64x128xf32>
    %cst_9 = arith.constant dense<0.000000e+00> : vector<128xf32>
    %59 = vector.multi_reduction <add>, %58, %cst_9 [0] : vector<64x128xf32> to vector<128xf32>
    %60 = vector.shape_cast %59 : vector<128xf32> to vector<1x128xf32>
    %61 = arith.mulf %52, %52 : vector<64x128xf32>
    %cst_10 = arith.constant dense<0.000000e+00> : vector<128xf32>
    %62 = vector.multi_reduction <add>, %61, %cst_10 [0] : vector<64x128xf32> to vector<128xf32>
    %63 = vector.shape_cast %62 : vector<128xf32> to vector<1x128xf32>
    %64 = tpu.concatenate %60, %63 in 1 : vector<1x128xf32>, vector<1x128xf32> -> vector<1x256xf32>
    %c0_11 = arith.constant 0 : index
    %c0_12 = arith.constant 0 : index
    %c0_13 = arith.constant 0 : index
    %65 = vector.load %arg6[%c0_11, %c0_12, %c0_13] : memref<1x2x256xf32, #tpu.memory_space<vmem>>, vector<1x2x256xf32>
    %66 = tpu.concatenate %57, %64 in 0 : vector<1x256xf32>, vector<1x256xf32> -> vector<2x256xf32>
    %67 = vector.shape_cast %66 : vector<2x256xf32> to vector<1x2x256xf32>
    %68 = arith.addf %65, %67 : vector<1x2x256xf32>
    %c0_14 = arith.constant 0 : index
    %c0_15 = arith.constant 0 : index
    %c0_16 = arith.constant 0 : index
    %69 = vector.load %arg6[%c0_14, %c0_15, %c0_16] : memref<1x2x256xf32, #tpu.memory_space<vmem>>, vector<1x2x256xf32>
    tpu.vector_store %arg6[%c0_14, %c0_15, %c0_16], %68 {strides = array<i32>} : memref<1x2x256xf32, #tpu.memory_space<vmem>>, vector<1x2x256xf32>,
    return
  }
  func.func @transform_0(%arg0: i32, %arg1: i32) -> (i32, i32) {
    %c1_i32 = arith.constant 1 : i32
    %0 = arith.muli %arg0, %c1_i32 : i32
    %1 = arith.addi %0, %arg1 : i32
    %c0_i32 = arith.constant 0 : i32
    %c0_i32_0 = arith.constant 0 : i32
    return %1, %c0_i32 : i32, i32
  }
  func.func @transform_1(%arg0: i32, %arg1: i32) -> (i32, i32) {
    %c1_i32 = arith.constant 1 : i32
    %0 = arith.muli %arg0, %c1_i32 : i32
    %1 = arith.addi %0, %arg1 : i32
    %c0_i32 = arith.constant 0 : i32
    %c0_i32_0 = arith.constant 0 : i32
    return %1, %c0_i32 : i32, i32
  }
  func.func @transform_2(%arg0: i32, %arg1: i32) -> (i32, i32) {
    %c0_i32 = arith.constant 0 : i32
    %c0_i32_0 = arith.constant 0 : i32
    %c0_i32_1 = arith.constant 0 : i32
    return %c0_i32, %c0_i32_0 : i32, i32
  }
  func.func @transform_3(%arg0: i32, %arg1: i32) -> (i32, i32) {
    %c0_i32 = arith.constant 0 : i32
    %c0_i32_0 = arith.constant 0 : i32
    %c0_i32_1 = arith.constant 0 : i32
    return %c0_i32, %c0_i32_0 : i32, i32
  }
  func.func @transform_4(%arg0: i32, %arg1: i32) -> (i32, i32, i32) {
    %c0_i32 = arith.constant 0 : i32
    %c0_i32_0 = arith.constant 0 : i32
    %c0_i32_1 = arith.constant 0 : i32
    return %arg0, %c0_i32, %c0_i32_0 : i32, i32, i32
  }
}

</mosaic_0001>

<bundles_post_ra>
// kernel: factorized_reduce_forward.2
= control target key start
LH: loop header
LB: loop body
LE: loop exit
PB: predicated region body
PF: predicated region fallthrough
CT: control target
= control target key end

     0   :  { %s979_s15 = smov 0   ;;  %s981_s16 = smov 0   ;;  %s1232_s0 = inlined_call_operand.vmem [shape: f32[128,4], index: 0, kind: input, shape index: {}]   ;;  %s1233_s1 = inlined_call_operand.vmem [shape: f32[128,4], index: 1, kind: input, shape index: {}]   ;;  %s1234_s2 = inlined_call_operand.vmem [shape: f32[4,128], index: 2, kind: input, shape index: {}]   ;;  %s1235_s3 = inlined_call_operand.vmem [shape: f32[4,128], index: 3, kind: input, shape index: {}]   ;;  %s1236_s4 = inlined_call_operand.vmem [shape: f32[2,2,256], index: 4, kind: output, shape index: {}]  }
   0x1   :  { %s983_s17 = smov 0  }
   0x2 LB: > { %s26_s18 = sadd.s32 1, %s942_s16  ;;  %p857_p0 = scmp.ge.s32.totalorder %s946_s17, 1  ;;  %s946_s17 = sphi %s983_s17, %s14_s17   ;;  %s942_s16 = sphi %s981_s16, %s1238_s16   ;;  %s938_s15 = sphi %s979_s15, %s1237_s15  }
   0x3   : > { %p28_p1 = scmp.ge.s32.totalorder %s26_s18, 2  ;;  %p194_p2 = scmp.lt.s32.totalorder %s946_s17, 3 }
   0x5   : > { %s1240_s18 = smov (%p28_p1, %s26_s18), 0  ;;  %p195_p3 = pnand %p857_p0, %p194_p2 }
   0x6   : > { %s858_s19 = sshll.u32 (!%p195_p3), %s938_s15, 3  ;;  %v948_v0 = vmov (!%p195_p3), 3   ;;  %v949_v1 = vmov (!%p195_p3), 0   ;;  %v950_v9 = vmov (!%p195_p3), 1   ;;  %v951_v12 = vmov (!%p195_p3), 2   ;;  %p243_p5 = scmp.lt.s32.totalorder (!%p195_p3), %s938_s15, 1 }
   0x7   : > { %198 = sbr.rel (%p195_p3) target bundleno = 345 (0x159), region = 36  ;;  %900 = vset.pattern.permute.xlu0 (!%p195_p3), %v948_v0  ;;  %897 = vset.pattern.permute.xlu1 (!%p195_p3), %v949_v1  ;;  %p229_p4 = scmp.lt.s32.totalorder (!%p195_p3), %s858_s19, 15  ;;  %v302_v23 = vlaneseq (!%p195_p3)  ;;  %v261_v30 = vld [vmem:[%s1234_s2] sm:$0xf] (!%p195_p3)  ;;  %vm762_vm0 = vcmask (!%p195_p3), 1040384  }
   0x9   : > { %v1045_v26 = vshrl.u32 (!%p195_p3), %v302_v23, 7 }
   0xb   : > { %v304_v29 = vsub.s32 (!%p195_p3), 0, %v1045_v26  ;;  %v348_v31 = vsub.s32 (!%p195_p3), 1, %v1045_v26  ;;  %v400_v53 = vsub.s32 (!%p195_p3), 2, %v1045_v26  ;;  %v452_v57 = vsub.s32 (!%p195_p3), 3, %v1045_v26 }
   0xd   : > { %v1063_v34 = vrot.slane (!%p195_p3), %v261_v30, %v304_v29  ;;  %v1068_v36 = vrot.slane (!%p195_p3), %v261_v30, %v348_v31  ;;  %v1091_v59 = vrot.slane (!%p195_p3), %v261_v30, %v400_v53  ;;  %v1097_v62 = vrot.slane (!%p195_p3), %v261_v30, %v452_v57 }
   0xe   : > { %s1242_s19 = smov (!%p229_p4, %s858_s19), 15  ;;  %s1244_s15 = smov (!%p243_p5, %s938_s15), 1 }
   0xf   : > { %s859_s20 = sshll.u32 %s1242_s19, 3  ;;  %s866_s29 = sshll.u32 %s1244_s15, 2 }
  0x10   : > { %s232_s23 = scalar_lea.vmem %s1232_s0, %s859_s20  ;;  %s1008_s26 = scalar_lea.vmem %s1233_s1, %s859_s20 }
  0x11   : > { %v255_v2 = vld [vmem:[%s232_s23 + $0x10] sm:$0xff]  ;;  %v253_v3 = vld [vmem:[%s232_s23] sm:$0xff]  ;;  %v256_v4 = vld [vmem:[%s232_s23 + $0x18] sm:$0xff]  ;;  %s1111_s6 = scalar_lea.vmem %s1236_s4, %s866_s29 }
  0x12   : > { %274 = vperm.xlu1 %897, %v255_v2   ;;  %419 = vperm.xlu0 %900, %v253_v3   ;;  %v258_v5 = vld [vmem:[%s232_s23 + $0x28] sm:$0xff]  ;;  %v260_v6 = vld [vmem:[%s232_s23 + $0x38] sm:$0xff]  ;;  %v470_v7 = vld [vmem:[%s1008_s26] sm:$0xff] }
  0x13   : > { %v254_v8 = vld [vmem:[%s232_s23 + $0x8] sm:$0xff]  ;;  %v257_v10 = vld [vmem:[%s232_s23 + $0x20] sm:$0xff]  ;;  %v259_v11 = vld [vmem:[%s232_s23 + $0x30] sm:$0xff] }
  0x14   : > { %v471_v13 = vld [vmem:[%s1008_s26 + $0x8] sm:$0xff]  ;;  %v474_v15 = vld [vmem:[%s1008_s26 + $0x20] sm:$0xff]  ;;  %v476_v16 = vld [vmem:[%s1008_s26 + $0x30] sm:$0xff] }
  0x15   : > { %v1016_v14 = vld [vmem:[%s1008_s26 + $0x28] sm:$0xff]  ;;  %v472_v17 = vld [vmem:[%s1008_s26 + $0x10] sm:$0xff]  ;;  %v473_v18 = vld [vmem:[%s1008_s26 + $0x18] sm:$0xff] }
  0x16   : > { %279 = vperm.xlu1 %897, %v256_v4   ;;  %431 = vperm.xlu0 %900, %v256_v4   ;;  %v477_v35 = vld [vmem:[%s1008_s26 + $0x38] sm:$0xff] }
  0x1a   : > { %289 = vperm.xlu1 %897, %v258_v5   ;;  %439 = vperm.xlu0 %900, %v258_v5  }
  0x1e   : > { %299 = vperm.xlu1 %897, %v260_v6   ;;  %447 = vperm.xlu0 %900, %v260_v6  }
  0x22   : > { %898 = vset.pattern.permute.xlu1 %v950_v9  ;;  %636 = vperm.xlu0 %900, %v470_v7  }
  0x23   : > { %319 = vperm.xlu1 %898, %v254_v8  }
  0x26   : > { %907 = vset.pattern.permute.xlu0 %v950_v9 }
  0x27   : > { %323 = vperm.xlu1 %898, %v255_v2   ;;  %315 = vperm.xlu0 %907, %v253_v3  }
  0x2b   : > { %331 = vperm.xlu1 %898, %v257_v10   ;;  %327 = vperm.xlu0 %907, %v256_v4  }
  0x2f   : > { %339 = vperm.xlu1 %898, %v259_v11   ;;  %335 = vperm.xlu0 %907, %v258_v5  }
  0x33   : > { %899 = vset.pattern.permute.xlu1 %v951_v12  ;;  %343 = vperm.xlu0 %907, %v260_v6  }
  0x34   : > { %367 = vperm.xlu1 %899, %v253_v3  }
  0x37   : > { %536 = vperm.xlu0 %907, %v471_v13  }
  0x38   : > { %375 = vperm.xlu1 %899, %v255_v2  }
  0x3b   : > { %552 = vperm.xlu0 %907, %v1016_v14  }
  0x3c   : > { %379 = vperm.xlu1 %899, %v256_v4  }
  0x3f   : > { %912 = vset.pattern.permute.xlu0 %v949_v1 }
  0x40   : > { %264 = vperm.xlu0 %912, %v253_v3   ;;  %387 = vperm.xlu1 %899, %v258_v5  }
  0x44   : > { %269 = vperm.xlu0 %912, %v254_v8   ;;  %395 = vperm.xlu1 %899, %v260_v6  }
  0x48   : > { %284 = vperm.xlu0 %912, %v257_v10   ;;  %901 = vset.pattern.permute.xlu1 %v948_v0 }
  0x49   : > { %423 = vperm.xlu1 %901, %v254_v8  }
  0x4c   : > { %294 = vperm.xlu0 %912, %v259_v11  }
  0x4d   : > { %427 = vperm.xlu1 %901, %v255_v2  }
  0x50   : > { %486 = vperm.xlu0 %912, %v471_v13  }
  0x51   : > { %435 = vperm.xlu1 %901, %v257_v10  }
  0x54   : > { %501 = vperm.xlu0 %912, %v474_v15  }
  0x55   : > { %443 = vperm.xlu1 %901, %v259_v11  }
  0x58   : > { %511 = vperm.xlu0 %912, %v476_v16  }
  0x59   : > { %902 = vset.pattern.permute.xlu1 %v949_v1 }
  0x5a   : > { %481 = vperm.xlu1 %902, %v470_v7  }
  0x5c   : > { %915 = vset.pattern.permute.xlu0 %v951_v12 }
  0x5d   : > { %371 = vperm.xlu0 %915, %v254_v8  }
  0x5e   : > { %491 = vperm.xlu1 %902, %v472_v17  }
  0x61   : > { %383 = vperm.xlu0 %915, %v257_v10  }
  0x62   : > { %496 = vperm.xlu1 %902, %v473_v18  }
  0x65   : > { %391 = vperm.xlu0 %915, %v259_v11  }
  0x66   : > { %903 = vset.pattern.permute.xlu1 %v950_v9 }
  0x67   : > { %532 = vperm.xlu1 %903, %v470_v7  }
  0x69   : > { %588 = vperm.xlu0 %915, %v471_v13  }
  0x6b   : > { %540 = vperm.xlu1 %903, %v472_v17  }
  0x6d   : > { %596 = vperm.xlu0 %915, %v473_v18  }
  0x6f   : > { %904 = vset.pattern.permute.xlu1 %v951_v12 }
  0x70   : > { %584 = vperm.xlu1 %904, %v470_v7   ;;  %v952_v7 = vmov 0.0  }
  0x71   : > { %608 = vperm.xlu0 %915, %v476_v16   ;;  %252 = vst [vmem:[%s1111_s6] sm:$0xf] %v952_v7 }
  0x74   : > { %905 = vset.pattern.permute.xlu1 %v950_v9 }
  0x75   : > { %544 = vperm.xlu1 %905, %v473_v18   ;;  %920 = vset.pattern.permute.xlu0 %v948_v0 }
  0x76   : > { %652 = vperm.xlu0 %920, %v474_v15  }
  0x79   : > { %906 = vset.pattern.permute.xlu1 %v951_v12 }
  0x7a   : > { %592 = vperm.xlu1 %906, %v472_v17   ;;  %660 = vperm.xlu0 %920, %v476_v16  }
  0x7e   : > { %908 = vset.pattern.permute.xlu1 %v948_v0 }
  0x7f   : > { %640 = vperm.xlu1 %908, %v471_v13  }
  0x83   : > { %909 = vset.pattern.permute.xlu1 %v950_v9 }
  0x84   : > { %548 = vperm.xlu1 %909, %v474_v15  }
  0x88   : > { %910 = vset.pattern.permute.xlu1 %v948_v0 }
  0x89   : > { %644 = vperm.xlu1 %910, %v472_v17  }
  0x8d   : > { %911 = vset.pattern.permute.xlu1 %v949_v1 }
  0x8e   : > { %506 = vperm.xlu1 %911, %v1016_v14  }
  0x91   : > { %v275_v19 = vpop.permute.xlu1 %274  ;;  %v1037_v20 = vpop.permute.xlu0 %419 }
  0x92   : > { %913 = vset.pattern.permute.xlu1 %v951_v12  ;;  %v308_v39 = vmul.f32 %v1063_v34, %v275_v19 }
  0x93   : > { %600 = vperm.xlu1 %913, %v474_v15  }
  0x95   : > { %v280_v21 = vpop.permute.xlu1 %279  ;;  %v1040_v22 = vpop.permute.xlu0 %431 }
  0x96   : > { %v309_v44 = vmul.f32 %v1063_v34, %v280_v21  ;;  %v457_v4 = vmul.f32 %v1097_v62, %v1040_v22 }
  0x97   : > { %914 = vset.pattern.permute.xlu1 %v948_v0 }
  0x98   : > { %648 = vperm.xlu1 %914, %v473_v18  }
  0x99   : > { %v290_v24 = vpop.permute.xlu1 %289  ;;  %v1043_v25 = vpop.permute.xlu0 %439 }
  0x9a   : > { %v311_v49 = vmul.f32 %v1063_v34, %v290_v24  ;;  %v459_v10 = vmul.f32 %v1097_v62, %v1043_v25 }
  0x9c   : > { %916 = vset.pattern.permute.xlu1 %v950_v9 }
  0x9d   : > { %v300_v27 = vpop.permute.xlu1 %299  ;;  %556 = vperm.xlu1 %916, %v476_v16   ;;  %v1048_v28 = vpop.permute.xlu0 %447 }
  0x9e   : > { %v313_v54 = vmul.f32 %v1063_v34, %v300_v27  ;;  %v461_v21 = vmul.f32 %v1097_v62, %v1048_v28 }
  0xa1   : > { %917 = vset.pattern.permute.xlu1 %v951_v12  ;;  %v1056_v32 = vpop.permute.xlu0 %636 }
  0xa2   : > { %v1058_v33 = vpop.permute.xlu1 %319  ;;  %604 = vperm.xlu1 %917, %v1016_v14  }
  0xa6   : > { %v324_v37 = vpop.permute.xlu1 %323  ;;  %v316_v38 = vpop.permute.xlu0 %315  ;;  %918 = vset.pattern.permute.xlu1 %v949_v1 }
  0xa7   : > { %v352_v40 = vmul.f32 %v1068_v36, %v324_v37  ;;  %516 = vperm.xlu1 %918, %v477_v35   ;;  %v350_v6 = vmul.f32 %v1068_v36, %v316_v38 }
  0xa9   : > { %v360_v41 = vadd.f32 %v352_v40, %v308_v39 }
  0xaa   : > { %v1073_v42 = vpop.permute.xlu1 %331  ;;  %v328_v43 = vpop.permute.xlu0 %327 }
  0xab   : > { %v353_v45 = vmul.f32 %v1068_v36, %v328_v43  ;;  %919 = vset.pattern.permute.xlu1 %v950_v9 }
  0xac   : > { %560 = vperm.xlu1 %919, %v477_v35  }
  0xad   : > { %v361_v46 = vadd.f32 %v353_v45, %v309_v44 }
  0xae   : > { %v1078_v47 = vpop.permute.xlu1 %339  ;;  %v336_v48 = vpop.permute.xlu0 %335 }
  0xaf   : > { %v355_v50 = vmul.f32 %v1068_v36, %v336_v48 }
  0xb0   : > { %921 = vset.pattern.permute.xlu1 %v948_v0 }
  0xb1   : > { %v363_v51 = vadd.f32 %v355_v50, %v311_v49  ;;  %656 = vperm.xlu1 %921, %v1016_v14   ;;  %v454_v14 = vmul.f32 %v1097_v62, %v1037_v20  ;;  %v351_v49 = vmul.f32 %v1068_v36, %v1058_v33 }
  0xb2   : > { %v344_v52 = vpop.permute.xlu0 %343 }
  0xb3   : > { %v357_v55 = vmul.f32 %v1068_v36, %v344_v52  ;;  %v368_v56 = vpop.permute.xlu1 %367 }
  0xb4   : > { %v402_v15 = vmul.f32 %v1091_v59, %v368_v56  ;;  %v354_v56 = vmul.f32 %v1068_v36, %v1073_v42 }
  0xb5   : > { %v365_v58 = vadd.f32 %v357_v55, %v313_v54  ;;  %922 = vset.pattern.permute.xlu1 %v951_v12 }
  0xb6   : > { %612 = vperm.xlu1 %922, %v477_v35   ;;  %v1093_v60 = vpop.permute.xlu0 %536 }
  0xb7   : > { %v376_v61 = vpop.permute.xlu1 %375 }
  0xb8   : > { %v404_v63 = vmul.f32 %v1091_v59, %v376_v61 }
  0xba   : > { %v412_v1 = vadd.f32 %v404_v63, %v360_v41  ;;  %923 = vset.pattern.permute.xlu1 %v948_v0  ;;  %v1102_v2 = vpop.permute.xlu0 %552 }
  0xbb   : > { %664 = vperm.xlu1 %923, %v477_v35   ;;  %v380_v3 = vpop.permute.xlu1 %379 }
  0xbc   : > { %v405_v5 = vmul.f32 %v1091_v59, %v380_v3 }
  0xbe   : > { %v413_v0 = vadd.f32 %v405_v5, %v361_v46 }
  0xbf   : > { %v265_v8 = vpop.permute.xlu0 %264  ;;  %v388_v9 = vpop.permute.xlu1 %387 }
  0xc0   : > { %v465_v11 = vadd.f32 %v457_v4, %v413_v0  ;;  %v306_v12 = vmul.f32 %v1063_v34, %v265_v8  ;;  %v407_v13 = vmul.f32 %v1091_v59, %v388_v9 }
  0xc2   : > { %v358_v16 = vadd.f32 %v350_v6, %v306_v12  ;;  %v415_v17 = vadd.f32 %v407_v13, %v363_v51  ;;  %v356_v6 = vmul.f32 %v1068_v36, %v1078_v47  ;;  %v478_v36 = vld [vmem:[%s1235_s3] sm:$0xf] }
  0xc3   : > { %v270_v18 = vpop.permute.xlu0 %269  ;;  %v396_v19 = vpop.permute.xlu1 %395 }
  0xc4   : > { %v410_v22 = vadd.f32 %v402_v15, %v358_v16  ;;  %v467_v23 = vadd.f32 %v459_v10, %v415_v17  ;;  %v409_v24 = vmul.f32 %v1091_v59, %v396_v19  ;;  %v307_v46 = vmul.f32 %v1063_v34, %v270_v18 }
  0xc5   : > { %v716_v17 = vmul.f32 %v465_v11, %v465_v11 }
  0xc6   : > { %v462_v25 = vadd.f32 %v454_v14, %v410_v22  ;;  %v417_v27 = vadd.f32 %v409_v24, %v365_v58  ;;  %v359_v51 = vadd.f32 %v351_v49, %v307_v46  ;;  %v1158_v24 = vrot.slane %v478_v36, %v348_v31 }
  0xc7   : > { %v285_v30 = vpop.permute.xlu0 %284  ;;  %v1167_v31 = vrot.slane %v478_v36, %v452_v57  ;;  %v1172_v49 = vrot.slane %v478_v36, %v400_v53 }
  0xc8   : > { %v1125_v35 = vadd.f32 %v461_v21, %v417_v27  ;;  %v424_v37 = vpop.permute.xlu1 %423  ;;  %v310_v52 = vmul.f32 %v1063_v34, %v285_v30  ;;  %v713_v0 = vmul.f32 %v462_v25, %v462_v25 }
  0xc9   : > { %v455_v58 = vmul.f32 %v1097_v62, %v424_v37  ;;  %v671_v57 = vmul.f32 %v1167_v31, %v1056_v32 }
  0xca   : > { %v362_v3 = vadd.f32 %v354_v56, %v310_v52 }
  0xcb   : > { %v295_v20 = vpop.permute.xlu0 %294 }
  0xcc   : > { %v428_v38 = vpop.permute.xlu1 %427  ;;  %v312_v63 = vmul.f32 %v1063_v34, %v295_v20 }
  0xcd   : > { %v456_v39 = vmul.f32 %v1097_v62, %v428_v38  ;;  %v718_v38 = vmul.f32 %v467_v23, %v467_v23 }
  0xce   : > { %v364_v10 = vadd.f32 %v356_v6, %v312_v63 }
  0xcf   : > { %v464_v40 = vadd.f32 %v456_v39, %v412_v1  ;;  %v1128_v41 = vpop.permute.xlu0 %486 }
  0xd0   : > { %v436_v43 = vpop.permute.xlu1 %435 }
  0xd1   : > { %v458_v7 = vmul.f32 %v1097_v62, %v436_v43  ;;  %v715_v12 = vmul.f32 %v464_v40, %v464_v40 }
  0xd3   : > { %v1130_v44 = vpop.permute.xlu0 %501 }
  0xd4   : > { %v444_v28 = vpop.permute.xlu1 %443 }
  0xd5   : > { %v460_v47 = vmul.f32 %v1097_v62, %v444_v28 }
  0xd7   : > { %v1132_v45 = vpop.permute.xlu0 %511 }
  0xd9   : > { %v482_v48 = vpop.permute.xlu1 %481 }
  0xdc   : > { %v372_v50 = vpop.permute.xlu0 %371 }
  0xdd   : > { %v403_v54 = vmul.f32 %v1091_v59, %v372_v50  ;;  %v1139_v55 = vpop.permute.xlu1 %491 }
  0xdf   : > { %v411_v61 = vadd.f32 %v403_v54, %v359_v51 }
  0xe0   : > { %v384_v1 = vpop.permute.xlu0 %383 }
  0xe1   : > { %v463_v4 = vadd.f32 %v455_v58, %v411_v61  ;;  %v406_v33 = vmul.f32 %v1091_v59, %v384_v1  ;;  %v1146_v5 = vpop.permute.xlu1 %496 }
  0xe3   : > { %v687_v8 = vadd.f32 %v463_v4, %v462_v25  ;;  %v714_v42 = vmul.f32 %v463_v4, %v463_v4  ;;  %v414_v9 = vadd.f32 %v406_v33, %v362_v3 }
  0xe4   : > { %v392_v13 = vpop.permute.xlu0 %391 }
  0xe5   : > { %v688_v34 = vadd.f32 %v687_v8, %v464_v40  ;;  %v721_v14 = vadd.f32 %v714_v42, %v713_v0  ;;  %v466_v15 = vadd.f32 %v458_v7, %v414_v9  ;;  %v408_v16 = vmul.f32 %v1091_v59, %v392_v13 }
  0xe6   : > { %v533_v18 = vpop.permute.xlu1 %532  ;;  %v1162_v59 = vrot.slane %v478_v36, %v304_v29  ;;  %v720_v29 = vmul.f32 %v1125_v35, %v1125_v35  ;;  %v568_v36 = vmul.f32 %v1158_v24, %v1093_v60 }
  0xe7   : > { %v722_v19 = vadd.f32 %v721_v14, %v715_v12  ;;  %v689_v21 = vadd.f32 %v688_v34, %v465_v11  ;;  %v416_v22 = vadd.f32 %v408_v16, %v364_v10  ;;  %v717_v27 = vmul.f32 %v466_v15, %v466_v15 }
  0xe8   : > { %v567_v62 = vmul.f32 %v1158_v24, %v533_v18  ;;  %v523_v46 = vmul.f32 %v1162_v59, %v482_v48  ;;  %v589_v18 = vpop.permute.xlu0 %588  ;;  %v526_v60 = vmul.f32 %v1162_v59, %v1146_v5  ;;  %v527_v5 = vmul.f32 %v1162_v59, %v1130_v44 }
  0xe9   : > { %v690_v25 = vadd.f32 %v689_v21, %v466_v15  ;;  %v723_v30 = vadd.f32 %v722_v19, %v716_v17  ;;  %v468_v37 = vadd.f32 %v460_v47, %v416_v22  ;;  %v524_v47 = vmul.f32 %v1162_v59, %v1128_v41 }
  0xea   : > { %v541_v20 = vpop.permute.xlu1 %540  ;;  %v575_v52 = vadd.f32 %v567_v62, %v523_v46 }
  0xeb   : > { %v724_v39 = vadd.f32 %v723_v30, %v717_v27  ;;  %v691_v40 = vadd.f32 %v690_v25, %v467_v23  ;;  %v719_v43 = vmul.f32 %v468_v37, %v468_v37  ;;  %v576_v22 = vadd.f32 %v568_v36, %v524_v47 }
  0xec   : > { %v597_v19 = vpop.permute.xlu0 %596  ;;  %v620_v25 = vmul.f32 %v1172_v49, %v589_v18  ;;  %v569_v27 = vmul.f32 %v1158_v24, %v541_v20 }
  0xed   : > { %v692_v11 = vadd.f32 %v691_v40, %v468_v37  ;;  %v725_v28 = vadd.f32 %v724_v39, %v718_v38  ;;  %v525_v38 = vmul.f32 %v1162_v59, %v1139_v55 }
  0xee   : > { %v628_v40 = vadd.f32 %v620_v25, %v576_v22 }
  0xef   : > { %v693_v23 = vadd.f32 %v692_v11, %v1125_v35  ;;  %v726_v50 = vadd.f32 %v725_v28, %v719_v43  ;;  %v585_v51 = vpop.permute.xlu1 %584  ;;  %v577_v11 = vadd.f32 %v569_v27, %v525_v38  ;;  %v622_v28 = vmul.f32 %v1172_v49, %v597_v19 }
  0xf0   : > { %v619_v54 = vmul.f32 %v1172_v49, %v585_v51  ;;  %v609_v41 = vpop.permute.xlu0 %608 }
  0xf1   : > { %v694_v56 = vrot.slane %v693_v23, 4  ;;  %v727_v58 = vadd.f32 %v726_v50, %v720_v29 }
  0xf2   : > { %v627_v48 = vadd.f32 %v619_v54, %v575_v52 }
  0xf3   : > { %v695_v61 = vadd.f32 %v694_v56, %v693_v23  ;;  %v728_v63 = vrot.slane %v727_v58, 4 }
  0xf4   : > { %v679_v53 = vadd.f32 %v671_v57, %v627_v48  ;;  %v545_v1 = vpop.permute.xlu1 %544 }
  0xf5   : > { %v696_v3 = vrot.slane %v695_v61, 2  ;;  %v729_v4 = vadd.f32 %v728_v63, %v727_v58  ;;  %v570_v30 = vmul.f32 %v1158_v24, %v545_v1  ;;  %v653_v56 = vpop.permute.xlu0 %652 }
  0xf7   : > { %v697_v33 = vadd.f32 %v696_v3, %v695_v61  ;;  %v730_v6 = vrot.slane %v729_v4, 2  ;;  %v578_v43 = vadd.f32 %v570_v30, %v526_v60  ;;  %v572_v61 = vmul.f32 %v1158_v24, %v1102_v2 }
  0xf9   : > { %v731_v35 = vadd.f32 %v730_v6, %v729_v4  ;;  %v593_v0 = vpop.permute.xlu1 %592  ;;  %v698_v7 = vrot.slane %v697_v33, 1  ;;  %v630_v51 = vadd.f32 %v622_v28, %v578_v43  ;;  %v734_v4 = vmul.f32 %v679_v53, %v679_v53 }
  0xfa   : > { %v621_v39 = vmul.f32 %v1172_v49, %v593_v0  ;;  %v675_v6 = vmul.f32 %v1167_v31, %v653_v56 }
  0xfb   : > { %v732_v8 = vrot.slane %v731_v35, 1  ;;  %v699_v10 = vadd.f32 %v698_v7, %v697_v33 }
  0xfc   : > { %v629_v23 = vadd.f32 %v621_v39, %v577_v11 }
  0xfd   : > { %v733_v42 = vadd.f32 %v732_v8, %v731_v35  ;;  %v529_v35 = vmul.f32 %v1162_v59, %v1132_v45 }
  0xfe   : > { %v641_v9 = vpop.permute.xlu1 %640 }
  0xff   : > { %v758_v12 = vrot.slane %v733_v42, 7  ;;  %v672_v37 = vmul.f32 %v1167_v31, %v641_v9 }
 0x101   : > { %v1181_v32 = vsel %vm762_vm0, %v699_v10, %v758_v12  ;;  %v680_v46 = vadd.f32 %v672_v37, %v628_v40 }
 0x103   : > { %v549_v13 = vpop.permute.xlu1 %548  ;;  %v735_v57 = vmul.f32 %v680_v46, %v680_v46  ;;  %v700_v44 = vadd.f32 %v680_v46, %v679_v53  ;;  %v625_v53 = vmul.f32 %v1172_v49, %v609_v41 }
 0x104   : > { %v571_v29 = vmul.f32 %v1158_v24, %v549_v13 }
 0x105   : > { %v742_v8 = vadd.f32 %v735_v57, %v734_v4 }
 0x106   : > { %v579_v48 = vadd.f32 %v571_v29, %v527_v5 }
 0x108   : > { %v645_v34 = vpop.permute.xlu1 %644 }
 0x109   : > { %v673_v20 = vmul.f32 %v1167_v31, %v645_v34 }
 0x10b   : > { %v681_v52 = vadd.f32 %v673_v20, %v629_v23 }
 0x10d   : > { %v507_v14 = vpop.permute.xlu1 %506  ;;  %v736_v0 = vmul.f32 %v681_v52, %v681_v52  ;;  %v701_v42 = vadd.f32 %v700_v44, %v681_v52 }
 0x10e   : > { %v528_v54 = vmul.f32 %v1162_v59, %v507_v14  ;;  %v661_v14 = vpop.permute.xlu0 %660 }
 0x10f   : > { %v677_v45 = vmul.f32 %v1167_v31, %v661_v14 }
 0x110   : > { %v580_v7 = vadd.f32 %v572_v61, %v528_v54  ;;  %v953_v54 = vmov 1983009808  }
 0x111   : > { %v769_v56 = vunpack.c.l.s4 %v953_v54 }
 0x112   : > { %v601_v15 = vpop.permute.xlu1 %600 }
 0x113   : > { %v623_v50 = vmul.f32 %v1172_v49, %v601_v15  ;;  %v743_v15 = vadd.f32 %v742_v8, %v736_v0 }
 0x115   : > { %v631_v33 = vadd.f32 %v623_v50, %v579_v48  ;;  %v770_v48 = vunpack.c.0.s8 %v769_v56 }
 0x117   : > { %v649_v16 = vpop.permute.xlu1 %648  ;;  %v683_v34 = vadd.f32 %v675_v6, %v631_v33  ;;  %v755_v33 = vld [vmem:[%s1111_s6] sm:$0xf] }
 0x118   : > { %v674_v55 = vmul.f32 %v1167_v31, %v649_v16 }
 0x11a   : > { %v682_v63 = vadd.f32 %v674_v55, %v630_v51 }
 0x11c   : > { %v557_v17 = vpop.permute.xlu1 %556  ;;  %v737_v10 = vmul.f32 %v682_v63, %v682_v63  ;;  %v702_v16 = vadd.f32 %v701_v42, %v682_v63 }
 0x11d   : > { %v573_v1 = vmul.f32 %v1158_v24, %v557_v17 }
 0x11e   : > { %v744_v18 = vadd.f32 %v743_v15, %v737_v10  ;;  %v703_v25 = vadd.f32 %v702_v16, %v683_v34 }
 0x11f   : > { %v581_v2 = vadd.f32 %v573_v1, %v529_v35 }
 0x121   : > { %v605_v21 = vpop.permute.xlu1 %604  ;;  %v633_v36 = vadd.f32 %v625_v53, %v581_v2 }
 0x122   : > { %v624_v3 = vmul.f32 %v1172_v49, %v605_v21  ;;  %v738_v21 = vmul.f32 %v683_v34, %v683_v34 }
 0x123   : > { %v685_v37 = vadd.f32 %v677_v45, %v633_v36 }
 0x124   : > { %v632_v12 = vadd.f32 %v624_v3, %v580_v7  ;;  %v745_v60 = vadd.f32 %v744_v18, %v738_v21  ;;  %v773_v3 = vsub.s32 %v770_v48, %v1045_v26 }
 0x125   : > { %v740_v28 = vmul.f32 %v685_v37, %v685_v37 }
 0x126   : > { %v517_v62 = vpop.permute.xlu1 %516 }
 0x127   : > { %v530_v22 = vmul.f32 %v1162_v59, %v517_v62 }
 0x12b   : > { %v561_v58 = vpop.permute.xlu1 %560 }
 0x12c   : > { %v574_v47 = vmul.f32 %v1158_v24, %v561_v58 }
 0x12e   : > { %v582_v38 = vadd.f32 %v574_v47, %v530_v22 }
 0x130   : > { %v657_v9 = vpop.permute.xlu1 %656 }
 0x131   : > { %v676_v13 = vmul.f32 %v1167_v31, %v657_v9 }
 0x133   : > { %v684_v17 = vadd.f32 %v676_v13, %v632_v12 }
 0x135   : > { %v613_v19 = vpop.permute.xlu1 %612  ;;  %v739_v27 = vmul.f32 %v684_v17, %v684_v17  ;;  %v704_v39 = vadd.f32 %v703_v25, %v684_v17 }
 0x136   : > { %v626_v30 = vmul.f32 %v1172_v49, %v613_v19 }
 0x137   : > { %v746_v40 = vadd.f32 %v745_v60, %v739_v27  ;;  %v705_v20 = vadd.f32 %v704_v39, %v685_v37 }
 0x138   : > { %v634_v11 = vadd.f32 %v626_v30, %v582_v38 }
 0x139   : > { %v747_v46 = vadd.f32 %v746_v40, %v740_v28 }
 0x13a   : > { %v665_v41 = vpop.permute.xlu1 %664 }
 0x13b   : > { %v678_v43 = vmul.f32 %v1167_v31, %v665_v41 }
 0x13d   : > { %v686_v24 = vadd.f32 %v678_v43, %v634_v11 }
 0x13f   : > { %v706_v29 = vadd.f32 %v705_v20, %v686_v24  ;;  %v741_v23 = vmul.f32 %v686_v24, %v686_v24 }
 0x141   : > { %v707_v59 = vrot.slane %v706_v29, 4  ;;  %v748_v62 = vadd.f32 %v747_v46, %v741_v23 }
 0x143   : > { %v708_v55 = vadd.f32 %v707_v59, %v706_v29  ;;  %v749_v5 = vrot.slane %v748_v62, 4 }
 0x145   : > { %v709_v49 = vrot.slane %v708_v55, 2  ;;  %v750_v50 = vadd.f32 %v749_v5, %v748_v62 }
 0x147   : > { %v710_v51 = vadd.f32 %v709_v49, %v708_v55  ;;  %v751_v52 = vrot.slane %v750_v50, 2 }
 0x149   : > { %v752_v58 = vadd.f32 %v751_v52, %v750_v50  ;;  %v711_v31 = vrot.slane %v710_v51, 1 }
 0x14b   : > { %v753_v57 = vrot.slane %v752_v58, 1  ;;  %v712_v63 = vadd.f32 %v711_v31, %v710_v51 }
 0x14d   : > { %v754_v61 = vadd.f32 %v753_v57, %v752_v58 }
 0x14f   : > { %v759_v1 = vrot.slane %v754_v61, 7 }
 0x151   : > { %v764_v4 = vsel %vm762_vm0, %v712_v63, %v759_v1 }
 0x152   : > { %v767_v44 = vcombine.low %v1181_v32, %v764_v4 }
 0x154   : > { %v774_v6 = vrot.slane %v767_v44, %v773_v3 }
 0x156   : > { %v776_v35 = vadd.f32 %v774_v6, %v755_v33 }
 0x158   : > { %777 = vst [vmem:[%s1111_s6] sm:$0xf] %v776_v35 }
 0x159 PF: > { %s14_s17 = sadd.s32 1, %s946_s17   ;;  %s1237_s15 = smov %s942_s16 }
 0x15a   : > { %p11_p6 = scmp.ge.s32.totalorder %s14_s17, 4   ;;  %s1238_s16 = smov %s1240_s18 }
 0x15c   :  { %13 = sbr.rel (!%p11_p6) target bundleno = 2 (0x2), region = 73 }

// kernel: factorized_reduce_forward.3
= control target key start
LH: loop header
LB: loop body
LE: loop exit
PB: predicated region body
PF: predicated region fallthrough
CT: control target
= control target key end

     0   :  { %s909_s18 = smov 0   ;;  %s1259_s0 = inlined_call_operand.vmem [shape: f32[128,4], index: 0, kind: input, shape index: {}]   ;;  %s1260_s1 = inlined_call_operand.vmem [shape: f32[128,4], index: 1, kind: input, shape index: {}]   ;;  %s1261_s2 = inlined_call_operand.vmem [shape: f32[4,128], index: 2, kind: input, shape index: {}]   ;;  %s1262_s3 = inlined_call_operand.vmem [shape: f32[4,128], index: 3, kind: input, shape index: {}]   ;;  %s1263_s4 = inlined_call_operand.vmem [shape: f32[2,256], index: 4, kind: input, shape index: {}]   ;;  %s1264_s5 = inlined_call_operand.vmem [shape: f32[128,256], index: 5, kind: output, shape index: {}]  }
   0x1 LB: > { %s824_s19 = sadd.s32 4294967295, %s873_s18   ;;  %p828_p0 = scmp.ge.s32.totalorder %s873_s18, 1  ;;  %s873_s18 = sphi %s909_s18, %s15_s18  }
   0x2   : > { %p199_p1 = scmp.lt.s32.totalorder %s873_s18, 3 }
   0x4   : > { %p200_p2 = pnand %p828_p0, %p199_p1 }
   0x5   : > { %s829_s20 = sshll.u32 (!%p200_p2), %s824_s19, 3  ;;  %v875_v0 = vmov (!%p200_p2), 0   ;;  %v876_v10 = vmov (!%p200_p2), 1   ;;  %v877_v13 = vmov (!%p200_p2), 2   ;;  %v878_v17 = vmov (!%p200_p2), 3  }
   0x6   : > { %203 = sbr.rel (%p200_p2) target bundleno = 297 (0x129), region = 40  ;;  %856 = vset.pattern.permute.xlu1 (!%p200_p2), %v875_v0  ;;  %855 = vset.pattern.permute.xlu0 (!%p200_p2), %v875_v0  ;;  %p234_p3 = scmp.lt.s32.totalorder (!%p200_p2), %s829_s20, 15  ;;  %v301_v40 = vlaneseq (!%p200_p2)  ;;  %v260_v48 = vld [vmem:[%s1261_s2] sm:$0xf] (!%p200_p2) }
   0x8   : > { %v1007_v43 = vshrl.u32 (!%p200_p2), %v301_v40, 7 }
   0xa   : > { %v303_v46 = vsub.s32 (!%p200_p2), 0, %v1007_v43  ;;  %v347_v47 = vsub.s32 (!%p200_p2), 1, %v1007_v43  ;;  %v399_v50 = vsub.s32 (!%p200_p2), 2, %v1007_v43  ;;  %v451_v57 = vsub.s32 (!%p200_p2), 3, %v1007_v43 }
   0xc   : > { %v1025_v52 = vrot.slane (!%p200_p2), %v260_v48, %v303_v46  ;;  %v1029_v53 = vrot.slane (!%p200_p2), %v260_v48, %v347_v47  ;;  %v1036_v56 = vrot.slane (!%p200_p2), %v260_v48, %v399_v50  ;;  %v1045_v63 = vrot.slane (!%p200_p2), %v260_v48, %v451_v57 }
   0xd   : > { %s1266_s20 = smov (!%p234_p3, %s829_s20), 15 }
   0xe   : > { %s830_s21 = sshll.u32 %s1266_s20, 3  ;;  %s842_s7 = sshll.u32 %s1266_s20, 4 }
   0xf   : > { %s237_s24 = scalar_lea.vmem %s1259_s0, %s830_s21  ;;  %s939_s27 = scalar_lea.vmem %s1260_s1, %s830_s21 }
  0x10   : > { %v254_v1 = vld [vmem:[%s237_s24 + $0x10] sm:$0xff]  ;;  %v925_v2 = vld [vmem:[%s237_s24] sm:$0xff]  ;;  %v928_v3 = vld [vmem:[%s237_s24 + $0x18] sm:$0xff]  ;;  %s1068_s12 = scalar_lea.vmem %s1264_s5, %s842_s7 }
  0x11   : > { %273 = vperm.xlu1 %856, %v254_v1   ;;  %263 = vperm.xlu0 %855, %v925_v2   ;;  %v253_v4 = vld [vmem:[%s237_s24 + $0x8] sm:$0xff]  ;;  %v256_v6 = vld [vmem:[%s237_s24 + $0x20] sm:$0xff]  ;;  %v934_v7 = vld [vmem:[%s237_s24 + $0x38] sm:$0xff] }
  0x12   : > { %v931_v5 = vld [vmem:[%s237_s24 + $0x28] sm:$0xff]  ;;  %v258_v8 = vld [vmem:[%s237_s24 + $0x30] sm:$0xff]  ;;  %v947_v11 = vld [vmem:[%s939_s27 + $0x20] sm:$0xff] }
  0x13   : > { %v943_v9 = vld [vmem:[%s939_s27 + $0x8] sm:$0xff]  ;;  %v951_v12 = vld [vmem:[%s939_s27 + $0x30] sm:$0xff]  ;;  %v469_v14 = vld [vmem:[%s939_s27] sm:$0xff] }
  0x14   : > { %v472_v15 = vld [vmem:[%s939_s27 + $0x18] sm:$0xff]  ;;  %v474_v16 = vld [vmem:[%s939_s27 + $0x28] sm:$0xff]  ;;  %v471_v19 = vld [vmem:[%s939_s27 + $0x10] sm:$0xff] }
  0x15   : > { %278 = vperm.xlu1 %856, %v928_v3   ;;  %268 = vperm.xlu0 %855, %v253_v4   ;;  %v476_v18 = vld [vmem:[%s939_s27 + $0x38] sm:$0xff] }
  0x19   : > { %288 = vperm.xlu1 %856, %v931_v5   ;;  %283 = vperm.xlu0 %855, %v256_v6  }
  0x1d   : > { %298 = vperm.xlu1 %856, %v934_v7   ;;  %293 = vperm.xlu0 %855, %v258_v8  }
  0x21   : > { %857 = vset.pattern.permute.xlu1 %v876_v10  ;;  %485 = vperm.xlu0 %855, %v943_v9  }
  0x22   : > { %318 = vperm.xlu1 %857, %v253_v4  }
  0x25   : > { %500 = vperm.xlu0 %855, %v947_v11  }
  0x26   : > { %322 = vperm.xlu1 %857, %v254_v1  }
  0x29   : > { %510 = vperm.xlu0 %855, %v951_v12  }
  0x2a   : > { %330 = vperm.xlu1 %857, %v256_v6  }
  0x2d   : > { %861 = vset.pattern.permute.xlu0 %v876_v10 }
  0x2e   : > { %338 = vperm.xlu1 %857, %v258_v8   ;;  %314 = vperm.xlu0 %861, %v925_v2  }
  0x32   : > { %858 = vset.pattern.permute.xlu1 %v877_v13  ;;  %326 = vperm.xlu0 %861, %v928_v3  }
  0x33   : > { %366 = vperm.xlu1 %858, %v925_v2  }
  0x36   : > { %334 = vperm.xlu0 %861, %v931_v5  }
  0x37   : > { %374 = vperm.xlu1 %858, %v254_v1  }
  0x3a   : > { %342 = vperm.xlu0 %861, %v934_v7  }
  0x3b   : > { %378 = vperm.xlu1 %858, %v928_v3  }
  0x3e   : > { %531 = vperm.xlu0 %861, %v469_v14  }
  0x3f   : > { %386 = vperm.xlu1 %858, %v931_v5  }
  0x42   : > { %543 = vperm.xlu0 %861, %v472_v15  }
  0x43   : > { %394 = vperm.xlu1 %858, %v934_v7  }
  0x46   : > { %551 = vperm.xlu0 %861, %v474_v16  }
  0x47   : > { %859 = vset.pattern.permute.xlu1 %v878_v17 }
  0x48   : > { %422 = vperm.xlu1 %859, %v253_v4  }
  0x4a   : > { %559 = vperm.xlu0 %861, %v476_v18  }
  0x4c   : > { %426 = vperm.xlu1 %859, %v254_v1  }
  0x4e   : > { %863 = vset.pattern.permute.xlu0 %v877_v13 }
  0x4f   : > { %370 = vperm.xlu0 %863, %v253_v4  }
  0x50   : > { %434 = vperm.xlu1 %859, %v256_v6  }
  0x53   : > { %382 = vperm.xlu0 %863, %v256_v6  }
  0x54   : > { %442 = vperm.xlu1 %859, %v258_v8  }
  0x57   : > { %390 = vperm.xlu0 %863, %v258_v8  }
  0x58   : > { %860 = vset.pattern.permute.xlu1 %v875_v0 }
  0x59   : > { %480 = vperm.xlu1 %860, %v469_v14  }
  0x5b   : > { %587 = vperm.xlu0 %863, %v943_v9  }
  0x5d   : > { %490 = vperm.xlu1 %860, %v471_v19  }
  0x5f   : > { %599 = vperm.xlu0 %863, %v947_v11  }
  0x61   : > { %495 = vperm.xlu1 %860, %v472_v15  }
  0x63   : > { %607 = vperm.xlu0 %863, %v951_v12  }
  0x65   : > { %505 = vperm.xlu1 %860, %v474_v16  }
  0x67   : > { %865 = vset.pattern.permute.xlu0 %v878_v17 }
  0x68   : > { %418 = vperm.xlu0 %865, %v925_v2  }
  0x69   : > { %515 = vperm.xlu1 %860, %v476_v18  }
  0x6c   : > { %430 = vperm.xlu0 %865, %v928_v3  }
  0x6d   : > { %862 = vset.pattern.permute.xlu1 %v876_v10 }
  0x6e   : > { %535 = vperm.xlu1 %862, %v943_v9  }
  0x70   : > { %438 = vperm.xlu0 %865, %v931_v5   ;;  %v1053_v5 = vld [vmem:[%s1263_s4] ss:$0 sm:$0xff] }
  0x72   : > { %539 = vperm.xlu1 %862, %v471_v19  }
  0x74   : > { %446 = vperm.xlu0 %865, %v934_v7  }
  0x76   : > { %547 = vperm.xlu1 %862, %v947_v11  }
  0x78   : > { %635 = vperm.xlu0 %865, %v469_v14  }
  0x7a   : > { %555 = vperm.xlu1 %862, %v951_v12  }
  0x7c   : > { %647 = vperm.xlu0 %865, %v472_v15  }
  0x7e   : > { %864 = vset.pattern.permute.xlu1 %v877_v13 }
  0x7f   : > { %583 = vperm.xlu1 %864, %v469_v14  }
  0x80   : > { %655 = vperm.xlu0 %865, %v474_v16  }
  0x83   : > { %591 = vperm.xlu1 %864, %v471_v19  }
  0x84   : > { %663 = vperm.xlu0 %865, %v476_v18  }
  0x87   : > { %595 = vperm.xlu1 %864, %v472_v15  }
  0x8b   : > { %603 = vperm.xlu1 %864, %v474_v16  }
  0x8f   : > { %611 = vperm.xlu1 %864, %v476_v18  }
  0x90   : > { %v274_v20 = vpop.permute.xlu1 %273  ;;  %v978_v21 = vpop.permute.xlu0 %263 }
  0x91   : > { %v307_v59 = vmul.f32 %v1025_v52, %v274_v20 }
  0x93   : > { %866 = vset.pattern.permute.xlu1 %v878_v17 }
  0x94   : > { %v980_v22 = vpop.permute.xlu1 %278  ;;  %639 = vperm.xlu1 %866, %v943_v9   ;;  %v269_v23 = vpop.permute.xlu0 %268 }
  0x95   : > { %v306_v0 = vmul.f32 %v1025_v52, %v269_v23 }
  0x98   : > { %v983_v24 = vpop.permute.xlu1 %288  ;;  %643 = vperm.xlu1 %866, %v471_v19   ;;  %v284_v25 = vpop.permute.xlu0 %283 }
  0x99   : > { %v309_v8 = vmul.f32 %v1025_v52, %v284_v25 }
  0x9c   : > { %v985_v26 = vpop.permute.xlu1 %298  ;;  %651 = vperm.xlu1 %866, %v947_v11   ;;  %v294_v27 = vpop.permute.xlu0 %293  ;;  %v1061_v11 = vld [vmem:[%s1263_s4 + $0x1] ss:$0 sm:$0xff] }
  0x9d   : > { %v311_v17 = vmul.f32 %v1025_v52, %v294_v27 }
  0xa0   : > { %659 = vperm.xlu1 %866, %v951_v12   ;;  %v989_v28 = vpop.permute.xlu0 %485 }
  0xa1   : > { %v319_v29 = vpop.permute.xlu1 %318 }
  0xa2   : > { %v350_v1 = vmul.f32 %v1029_v53, %v319_v29 }
  0xa4   : > { %v991_v30 = vpop.permute.xlu0 %500  ;;  %v358_v9 = vadd.f32 %v350_v1, %v306_v0 }
  0xa5   : > { %v323_v31 = vpop.permute.xlu1 %322 }
  0xa6   : > { %v351_v55 = vmul.f32 %v1029_v53, %v323_v31 }
  0xa8   : > { %v993_v32 = vpop.permute.xlu0 %510  ;;  %v359_v62 = vadd.f32 %v351_v55, %v307_v59 }
  0xa9   : > { %v331_v33 = vpop.permute.xlu1 %330 }
  0xaa   : > { %v353_v10 = vmul.f32 %v1029_v53, %v331_v33 }
  0xac   : > { %v361_v20 = vadd.f32 %v353_v10, %v309_v8  ;;  %v305_v10 = vmul.f32 %v1025_v52, %v978_v21 }
  0xad   : > { %v339_v34 = vpop.permute.xlu1 %338  ;;  %v995_v35 = vpop.permute.xlu0 %314 }
  0xae   : > { %v355_v23 = vmul.f32 %v1029_v53, %v339_v34 }
  0xb0   : > { %v363_v27 = vadd.f32 %v355_v23, %v311_v17 }
  0xb1   : > { %v997_v36 = vpop.permute.xlu0 %326 }
  0xb2   : > { %v999_v37 = vpop.permute.xlu1 %366  ;;  %v352_v17 = vmul.f32 %v1029_v53, %v997_v36  ;;  %v310_v36 = vmul.f32 %v1025_v52, %v983_v24  ;;  %v312_v24 = vmul.f32 %v1025_v52, %v985_v26 }
  0xb5   : > { %v1001_v38 = vpop.permute.xlu0 %334 }
  0xb6   : > { %v375_v39 = vpop.permute.xlu1 %374 }
  0xb7   : > { %v403_v60 = vmul.f32 %v1036_v56, %v375_v39 }
  0xb9   : > { %v1003_v41 = vpop.permute.xlu0 %342  ;;  %v411_v3 = vadd.f32 %v403_v60, %v359_v62 }
  0xba   : > { %v1005_v42 = vpop.permute.xlu1 %378 }
  0xbb   : > { %v404_v21 = vmul.f32 %v1036_v56, %v1005_v42 }
  0xbd   : > { %v1009_v44 = vpop.permute.xlu0 %531 }
  0xbe   : > { %v1011_v45 = vpop.permute.xlu1 %386 }
  0xc1   : > { %v1018_v49 = vpop.permute.xlu0 %543 }
  0xc2   : > { %v1021_v51 = vpop.permute.xlu1 %394 }
  0xc5   : > { %v1031_v54 = vpop.permute.xlu0 %551 }
  0xc7   : > { %v423_v58 = vpop.permute.xlu1 %422 }
  0xc8   : > { %v454_v15 = vmul.f32 %v1045_v63, %v423_v58 }
  0xc9   : > { %v1041_v61 = vpop.permute.xlu0 %559 }
  0xcb   : > { %v427_v2 = vpop.permute.xlu1 %426 }
  0xcc   : > { %v455_v4 = vmul.f32 %v1045_v63, %v427_v2 }
  0xce   : > { %v463_v6 = vadd.f32 %v455_v4, %v411_v3  ;;  %v371_v7 = vpop.permute.xlu0 %370 }
  0xcf   : > { %v402_v12 = vmul.f32 %v1036_v56, %v371_v7  ;;  %v435_v13 = vpop.permute.xlu1 %434 }
  0xd0   : > { %v693_v14 = vmul.f32 %v1053_v5, %v463_v6  ;;  %v457_v39 = vmul.f32 %v1045_v63, %v435_v13 }
  0xd1   : > { %v410_v16 = vadd.f32 %v402_v12, %v358_v9  ;;  %v349_v12 = vmul.f32 %v1029_v53, %v995_v35 }
  0xd2   : > { %v706_v18 = vadd.f32 %v1061_v11, %v693_v14  ;;  %v383_v19 = vpop.permute.xlu0 %382  ;;  %v401_v14 = vmul.f32 %v1036_v56, %v999_v37  ;;  %v354_v37 = vmul.f32 %v1029_v53, %v1001_v38  ;;  %v356_v38 = vmul.f32 %v1029_v53, %v1003_v41 }
  0xd3   : > { %v462_v25 = vadd.f32 %v454_v15, %v410_v16  ;;  %v405_v29 = vmul.f32 %v1036_v56, %v383_v19  ;;  %v443_v31 = vpop.permute.xlu1 %442  ;;  %v357_v16 = vadd.f32 %v349_v12, %v305_v10  ;;  %v308_v19 = vmul.f32 %v1025_v52, %v980_v22 }
  0xd4   : > { %714 = vst [vmem:[%s1068_s12 + $0x20] sm:$0xff] %v706_v18  ;;  %v459_v62 = vmul.f32 %v1045_v63, %v443_v31  ;;  %v406_v22 = vmul.f32 %v1036_v56, %v1011_v45  ;;  %v408_v45 = vmul.f32 %v1036_v56, %v1021_v51  ;;  %v364_v41 = vadd.f32 %v356_v38, %v312_v24 }
  0xd5   : > { %v692_v33 = vmul.f32 %v1053_v5, %v462_v25  ;;  %v413_v40 = vadd.f32 %v405_v29, %v361_v20  ;;  %v409_v20 = vadd.f32 %v401_v14, %v357_v16  ;;  %v360_v25 = vadd.f32 %v352_v17, %v308_v19 }
  0xd6   : > { %v391_v48 = vpop.permute.xlu0 %390 }
  0xd7   : > { %v705_v55 = vadd.f32 %v1061_v11, %v692_v33  ;;  %v465_v58 = vadd.f32 %v457_v39, %v413_v40  ;;  %v407_v59 = vmul.f32 %v1036_v56, %v391_v48  ;;  %v412_v33 = vadd.f32 %v404_v21, %v360_v25  ;;  %v477_v56 = vld [vmem:[%s1262_s3] sm:$0xf] }
  0xd8   : > { %v1080_v34 = vpop.permute.xlu1 %480  ;;  %v362_v48 = vadd.f32 %v354_v37, %v310_v36  ;;  %v1153_v14 = vrot.slane %v477_v56, %v303_v46  ;;  %v1157_v16 = vrot.slane %v477_v56, %v347_v47  ;;  %v1166_v19 = vrot.slane %v477_v56, %v451_v57  ;;  %v1180_v57 = vld [vmem:[%s1263_s4 + $0x2] ss:$0 sm:$0xff] }
  0xd9   : > { %713 = vst [vmem:[%s1068_s12 + $0x10] sm:$0xff] %v705_v55  ;;  %v695_v60 = vmul.f32 %v1053_v5, %v465_v58  ;;  %v415_v0 = vadd.f32 %v407_v59, %v363_v27  ;;  %v1173_v47 = vrot.slane %v477_v56, %v399_v50  ;;  %v1187_v50 = vld [vmem:[%s1263_s4 + $0x3] ss:$0 sm:$0xff] }
  0xda   : > { %v1085_v1 = vpop.permute.xlu0 %587  ;;  %v414_v59 = vadd.f32 %v406_v22, %v362_v48  ;;  %v566_v46 = vmul.f32 %v1157_v16, %v1009_v44  ;;  %v571_v48 = vmul.f32 %v1157_v16, %v1031_v54 }
  0xdb   : > { %v708_v2 = vadd.f32 %v1061_v11, %v695_v60  ;;  %v467_v3 = vadd.f32 %v459_v62, %v415_v0 }
  0xdc   : > { %v1088_v4 = vpop.permute.xlu1 %490 }
  0xdd   : > { %716 = vst [vmem:[%s1068_s12 + $0x40] sm:$0xff] %v708_v2  ;;  %v697_v6 = vmul.f32 %v1053_v5, %v467_v3 }
  0xde   : > { %v1092_v7 = vpop.permute.xlu0 %599 }
  0xdf   : > { %v710_v8 = vadd.f32 %v1061_v11, %v697_v6  ;;  %v416_v6 = vadd.f32 %v408_v45, %v364_v41  ;;  %v573_v45 = vmul.f32 %v1157_v16, %v1041_v61  ;;  %v523_v41 = vmul.f32 %v1153_v14, %v989_v28 }
  0xe0   : > { %v1095_v9 = vpop.permute.xlu1 %495 }
  0xe1   : > { %718 = vst [vmem:[%s1068_s12 + $0x60] sm:$0xff] %v710_v8  ;;  %v525_v43 = vmul.f32 %v1153_v14, %v1095_v9 }
  0xe2   : > { %v1102_v13 = vpop.permute.xlu0 %607 }
  0xe4   : > { %v1106_v15 = vpop.permute.xlu1 %505 }
  0xe5   : > { %v527_v22 = vmul.f32 %v1153_v14, %v1106_v15 }
  0xe7   : > { %v419_v18 = vpop.permute.xlu0 %418 }
  0xe8   : > { %v453_v35 = vmul.f32 %v1045_v63, %v419_v18  ;;  %v1115_v23 = vpop.permute.xlu1 %515  ;;  %v522_v18 = vmul.f32 %v1153_v14, %v1080_v34 }
  0xe9   : > { %v529_v24 = vmul.f32 %v1153_v14, %v1115_v23 }
  0xea   : > { %v461_v29 = vadd.f32 %v453_v35, %v409_v20  ;;  %v574_v21 = vadd.f32 %v566_v46, %v522_v18 }
  0xeb   : > { %v431_v31 = vpop.permute.xlu0 %430 }
  0xec   : > { %v691_v42 = vmul.f32 %v1053_v5, %v461_v29  ;;  %v456_v39 = vmul.f32 %v1045_v63, %v431_v31  ;;  %v569_v29 = vmul.f32 %v1157_v16, %v1018_v49 }
  0xed   : > { %v1125_v40 = vpop.permute.xlu1 %535 }
  0xee   : > { %v704_v27 = vadd.f32 %v1061_v11, %v691_v42  ;;  %v464_v55 = vadd.f32 %v456_v39, %v412_v33  ;;  %v577_v33 = vadd.f32 %v569_v29, %v525_v43  ;;  %v622_v29 = vmul.f32 %v1173_v47, %v1092_v7 }
  0xef   : > { %v439_v58 = vpop.permute.xlu0 %438 }
  0xf0   : > { %712 = vst [vmem:[%s1068_s12] sm:$0xff] %v704_v27  ;;  %v694_v60 = vmul.f32 %v1053_v5, %v464_v55  ;;  %v458_v62 = vmul.f32 %v1045_v63, %v439_v58  ;;  %v579_v55 = vadd.f32 %v571_v48, %v527_v22 }
  0xf1   : > { %v1137_v0 = vpop.permute.xlu1 %539 }
  0xf2   : > { %v707_v53 = vadd.f32 %v1061_v11, %v694_v60  ;;  %v466_v2 = vadd.f32 %v458_v62, %v414_v59  ;;  %v567_v59 = vmul.f32 %v1157_v16, %v1125_v40  ;;  %v568_v28 = vmul.f32 %v1157_v16, %v1137_v0 }
  0xf3   : > { %v447_v3 = vpop.permute.xlu0 %446 }
  0xf4   : > { %715 = vst [vmem:[%s1068_s12 + $0x30] sm:$0xff] %v707_v53  ;;  %v696_v26 = vmul.f32 %v1053_v5, %v466_v2  ;;  %v460_v51 = vmul.f32 %v1045_v63, %v447_v3  ;;  %v581_v2 = vadd.f32 %v573_v45, %v529_v24  ;;  %v575_v40 = vadd.f32 %v567_v59, %v523_v41 }
  0xf5   : > { %v1143_v52 = vpop.permute.xlu1 %547 }
  0xf6   : > { %v709_v8 = vadd.f32 %v1061_v11, %v696_v26  ;;  %v468_v10 = vadd.f32 %v460_v51, %v416_v6 }
  0xf8   : > { %717 = vst [vmem:[%s1068_s12 + $0x50] sm:$0xff] %v709_v8  ;;  %v698_v12 = vmul.f32 %v1053_v5, %v468_v10  ;;  %v636_v5 = vpop.permute.xlu0 %635  ;;  %v619_v8 = vmul.f32 %v1173_v47, %v1085_v1  ;;  %v570_v10 = vmul.f32 %v1157_v16, %v1143_v52  ;;  %v526_v1 = vmul.f32 %v1153_v14, %v991_v30 }
  0xf9   : > { %v1159_v63 = vpop.permute.xlu1 %555  ;;  %v528_v30 = vmul.f32 %v1153_v14, %v993_v32 }
  0xfa   : > { %v711_v17 = vadd.f32 %v1061_v11, %v698_v12  ;;  %v670_v11 = vmul.f32 %v1166_v19, %v636_v5  ;;  %v524_v5 = vmul.f32 %v1153_v14, %v1088_v4  ;;  %v572_v4 = vmul.f32 %v1157_v16, %v1159_v63 }
  0xfc   : > { %719 = vst [vmem:[%s1068_s12 + $0x70] sm:$0xff] %v711_v17  ;;  %v648_v25 = vpop.permute.xlu0 %647  ;;  %v576_v52 = vadd.f32 %v568_v28, %v524_v5  ;;  %v580_v22 = vadd.f32 %v572_v4, %v528_v30 }
  0xfd   : > { %v673_v38 = vmul.f32 %v1166_v19, %v648_v25 }
  0xfe   : > { %v584_v20 = vpop.permute.xlu1 %583 }
  0xff   : > { %v618_v35 = vmul.f32 %v1173_v47, %v584_v20  ;;  %v627_v20 = vadd.f32 %v619_v8, %v575_v40 }
 0x100   : > { %v656_v39 = vpop.permute.xlu0 %655 }
 0x101   : > { %v626_v34 = vadd.f32 %v618_v35, %v574_v21  ;;  %v675_v54 = vmul.f32 %v1166_v19, %v656_v39  ;;  %v578_v35 = vadd.f32 %v570_v10, %v526_v1 }
 0x102   : > { %v592_v37 = vpop.permute.xlu1 %591 }
 0x103   : > { %v678_v44 = vadd.f32 %v670_v11, %v626_v34  ;;  %v620_v46 = vmul.f32 %v1173_v47, %v592_v37  ;;  %v630_v63 = vadd.f32 %v622_v29, %v578_v35 }
 0x104   : > { %v664_v53 = vpop.permute.xlu0 %663 }
 0x105   : > { %v725_v36 = vmul.f32 %v1180_v57, %v678_v44  ;;  %v677_v61 = vmul.f32 %v1166_v19, %v664_v53  ;;  %v628_v37 = vadd.f32 %v620_v46, %v576_v52 }
 0x106   : > { %v596_v31 = vpop.permute.xlu1 %595 }
 0x107   : > { %v738_v42 = vadd.f32 %v1187_v50, %v725_v36  ;;  %v621_v9 = vmul.f32 %v1173_v47, %v596_v31 }
 0x109   : > { %746 = vst [vmem:[%s1068_s12 + $0x8] sm:$0xff] %v738_v42  ;;  %v629_v27 = vadd.f32 %v621_v9, %v577_v33  ;;  %v624_v9 = vmul.f32 %v1173_v47, %v1102_v13 }
 0x10a   : > { %v604_v49 = vpop.permute.xlu1 %603 }
 0x10b   : > { %v681_v58 = vadd.f32 %v673_v38, %v629_v27  ;;  %v623_v15 = vmul.f32 %v1173_v47, %v604_v49  ;;  %v632_v48 = vadd.f32 %v624_v9, %v580_v22 }
 0x10d   : > { %v728_v60 = vmul.f32 %v1180_v57, %v681_v58  ;;  %v631_v62 = vadd.f32 %v623_v15, %v579_v55 }
 0x10e   : > { %v612_v23 = vpop.permute.xlu1 %611 }
 0x10f   : > { %v741_v3 = vadd.f32 %v1187_v50, %v728_v60  ;;  %v683_v6 = vadd.f32 %v675_v54, %v631_v62  ;;  %v625_v26 = vmul.f32 %v1173_v47, %v612_v23 }
 0x111   : > { %749 = vst [vmem:[%s1068_s12 + $0x38] sm:$0xff] %v741_v3  ;;  %v730_v51 = vmul.f32 %v1180_v57, %v683_v6  ;;  %v633_v56 = vadd.f32 %v625_v26, %v581_v2 }
 0x113   : > { %v743_v12 = vadd.f32 %v1187_v50, %v730_v51  ;;  %v685_v17 = vadd.f32 %v677_v61, %v633_v56  ;;  %v640_v18 = vpop.permute.xlu1 %639 }
 0x114   : > { %v671_v21 = vmul.f32 %v1166_v19, %v640_v18 }
 0x115   : > { %751 = vst [vmem:[%s1068_s12 + $0x58] sm:$0xff] %v743_v12  ;;  %v732_v0 = vmul.f32 %v1180_v57, %v685_v17 }
 0x116   : > { %v679_v11 = vadd.f32 %v671_v21, %v627_v20 }
 0x117   : > { %v745_v34 = vadd.f32 %v1187_v50, %v732_v0  ;;  %v644_v25 = vpop.permute.xlu1 %643 }
 0x118   : > { %v726_v43 = vmul.f32 %v1180_v57, %v679_v11  ;;  %v672_v44 = vmul.f32 %v1166_v19, %v644_v25 }
 0x119   : > { %753 = vst [vmem:[%s1068_s12 + $0x78] sm:$0xff] %v745_v34 }
 0x11a   : > { %v739_v36 = vadd.f32 %v1187_v50, %v726_v43  ;;  %v680_v31 = vadd.f32 %v672_v44, %v628_v37 }
 0x11b   : > { %v652_v33 = vpop.permute.xlu1 %651 }
 0x11c   : > { %747 = vst [vmem:[%s1068_s12 + $0x18] sm:$0xff] %v739_v36  ;;  %v727_v16 = vmul.f32 %v1180_v57, %v680_v31  ;;  %v674_v42 = vmul.f32 %v1166_v19, %v652_v33 }
 0x11e   : > { %v740_v32 = vadd.f32 %v1187_v50, %v727_v16  ;;  %v682_v14 = vadd.f32 %v674_v42, %v630_v63 }
 0x11f   : > { %v660_v7 = vpop.permute.xlu1 %659 }
 0x120   : > { %748 = vst [vmem:[%s1068_s12 + $0x28] sm:$0xff] %v740_v32  ;;  %v729_v39 = vmul.f32 %v1180_v57, %v682_v14  ;;  %v676_v38 = vmul.f32 %v1166_v19, %v660_v7 }
 0x122   : > { %v742_v27 = vadd.f32 %v1187_v50, %v729_v39  ;;  %v684_v49 = vadd.f32 %v676_v38, %v632_v48 }
 0x124   : > { %750 = vst [vmem:[%s1068_s12 + $0x48] sm:$0xff] %v742_v27  ;;  %v731_v55 = vmul.f32 %v1180_v57, %v684_v49 }
 0x126   : > { %v744_v24 = vadd.f32 %v1187_v50, %v731_v55 }
 0x128   : > { %752 = vst [vmem:[%s1068_s12 + $0x68] sm:$0xff] %v744_v24 }
 0x129 PF: > { %s15_s18 = sadd.s32 1, %s873_s18  }
 0x12a   : > { %p12_p4 = scmp.ge.s32.totalorder %s15_s18, 4  }
 0x12c   :  { %14 = sbr.rel (!%p12_p4) target bundleno = 1 (0x1), region = 73 }

</bundles_post_ra>
